<compile_context>
chip_gen: v7x
topology: tpu7x:2x2x1
jax: 0.10.0
libtpu: 0.0.40
codegen_flags: <defaults>
</compile_context>

<pallas_src>
import jax
import jax.numpy as jnp
from jax.experimental import pallas as pl
from jax.experimental.pallas import tpu as pltpu

ENV_FEATURE_SIZE = 17
ACTION_FEATURE_SIZE = 1024
IN_FEATURES = ENV_FEATURE_SIZE + ACTION_FEATURE_SIZE  # 1041
H1 = 120
H2 = 84
PAD = 128      # lane padding for hidden dims
MAX_TM = 1024  # max rows per grid step (f32 action tile = 4 MiB, fits v5e VMEM)


def _qnet_kernel(act_ref, env_ref, w1a_ref, w1e_ref, b1_ref,
                 w2_ref, b2_ref, w3_ref, b3_ref, o_ref):
    """3-layer MLP on a (TM, ...) row tile, fully resident in VMEM."""
    # ---- Layer 1: split matmul.  Big bf16 action part (K=1024, lane aligned)
    # plus tiny f32 env part (K=17).  Both accumulate in f32 on the MXU.
    act = act_ref[...].astype(jnp.bfloat16)                          # (TM, 1024)
    h1 = jnp.dot(act, w1a_ref[...], preferred_element_type=jnp.float32)
    h1 = h1 + jnp.dot(env_ref[...], w1e_ref[...],
                      preferred_element_type=jnp.float32)
    h1 = jnp.maximum(h1 + b1_ref[...], 0.0)                          # (TM, 128)

    # ---- Layer 2
    h2 = jnp.dot(h1, w2_ref[...], preferred_element_type=jnp.float32) + b2_ref[...]
    h2 = jnp.maximum(h2, 0.0)                                        # (TM, 128)

    # ---- Layer 3: q = h2 @ w3 + b3, computed as w3_rows @ h2^T so the result
    # is lane-dense (rows land on the lane axis) and only 4 B/row hits HBM.
    q8 = jax.lax.dot_general(
        w3_ref[...], h2,
        dimension_numbers=(((1,), (1,)), ((), ())),
        preferred_element_type=jnp.float32)                          # (8, TM)
    q = q8[0:1, :] + b3_ref[0]                                       # (1, TM)
    o_ref[...] = q.reshape(o_ref.shape)                              # (1, 1, TM)


def _choose_tm(n_rows):
    """Rows per grid step: multiple of 128, capped at MAX_TM, >= ~8 grid steps
    when possible (pipeline depth / both v7x TensorCores)."""
    tm = -(-n_rows // 8)            # ceil(N / 8)
    tm = -(-tm // 128) * 128        # round up to a multiple of 128
    return max(128, min(MAX_TM, tm))


def prepare_params(params):
    """Pad/cast weights once (outside the per-call hot path).

    Returns (w1_action[1024,128] bf16, w1_env[17,128] f32, b1[1,128],
             w2[128,128], b2[1,128], w3[8,128] (row 0 used), b3[1]).
    Zero padding is inert through ReLU and the zeroed weight rows/cols."""
    w1, b1, w2, b2, w3, b3 = params
    w1 = w1.astype(jnp.float32)
    w1e = jnp.zeros((ENV_FEATURE_SIZE, PAD), jnp.float32).at[:, :H1].set(
        w1[:ENV_FEATURE_SIZE, :])
    w1a = jnp.zeros((ACTION_FEATURE_SIZE, PAD), jnp.float32).at[:, :H1].set(
        w1[ENV_FEATURE_SIZE:, :]).astype(jnp.bfloat16)
    b1p = jnp.zeros((1, PAD), jnp.float32).at[0, :H1].set(b1)
    w2p = jnp.zeros((PAD, PAD), jnp.float32).at[:H1, :H2].set(w2)
    b2p = jnp.zeros((1, PAD), jnp.float32).at[0, :H2].set(b2)
    w3p = jnp.zeros((8, PAD), jnp.float32).at[0, :H2].set(w3[:, 0])
    b3p = jnp.asarray(b3, jnp.float32).reshape(1)
    return (w1a, w1e, b1p, w2p, b2p, w3p, b3p)


@jax.jit
def qnetwork_forward(env_embedding, action_embedding, prepared_params):
    """Pallas implementation of QNetwork.forward (params from prepare_params)."""
    w1a, w1e, b1, w2, b2, w3, b3 = prepared_params
    B, E, Fe = env_embedding.shape
    _, _, A, Fa = action_embedding.shape
    assert Fe == ENV_FEATURE_SIZE
    assert Fa == ACTION_FEATURE_SIZE

    N = B * E * A
    TM = _choose_tm(N)
    n_steps = (N + TM - 1) // TM
    N_pad = n_steps * TM

    # Streams: the big action operand in its native dtype (pass bf16 upstream
    # to halve HBM read traffic) and a tiny broadcast env operand (68 B/row).
    # No (N, 1041) concat is ever materialized in HBM.
    act = action_embedding.reshape(N, ACTION_FEATURE_SIZE)
    env = jnp.broadcast_to(
        env_embedding[:, :, None, :], (B, E, A, ENV_FEATURE_SIZE)
    ).reshape(N, ENV_FEATURE_SIZE).astype(jnp.float32)
    if N_pad != N:
        # TODO(synk): for large ragged N this pad costs one extra pass over the
        # action operand; Pallas edge-block masking could remove it.
        act = jnp.pad(act, ((0, N_pad - N), (0, 0)))
        env = jnp.pad(env, ((0, N_pad - N), (0, 0)))

    resident = lambda shape: pl.BlockSpec(shape, lambda i: (0, 0))

    out = pl.pallas_call(
        _qnet_kernel,
        out_shape=jax.ShapeDtypeStruct((n_steps, 1, TM), jnp.float32),
        grid_spec=pltpu.PrefetchScalarGridSpec(
            num_scalar_prefetch=0,
            grid=(n_steps,),
            in_specs=[
                pl.BlockSpec((TM, ACTION_FEATURE_SIZE), lambda i: (i, 0)),  # action rows
                pl.BlockSpec((TM, ENV_FEATURE_SIZE), lambda i: (i, 0)),     # env rows
                resident((ACTION_FEATURE_SIZE, PAD)),   # w1 action part (bf16)
                resident((ENV_FEATURE_SIZE, PAD)),      # w1 env part (f32)
                resident((1, PAD)),                     # b1
                resident((PAD, PAD)),                   # w2
                resident((1, PAD)),                     # b2
                resident((8, PAD)),                     # w3 (row 0 used)
                pl.BlockSpec(memory_space=pltpu.MemorySpace.SMEM),  # b3 scalar
            ],
            out_specs=pl.BlockSpec((1, 1, TM), lambda i: (i, 0, 0)),
        ),
        compiler_params=pltpu.CompilerParams(
            dimension_semantics=("parallel",),
        ),
    )(act, env, w1a, w1e, b1, w2, b2, w3, b3)

    q = out.reshape(N_pad)[:N]
    return q.reshape(B, E, A)


def init_params(key):
    """Deterministic init mimicking torch.nn.Linear (uniform +/- 1/sqrt(fan_in))."""
    ks = jax.random.split(key, 6)

    def lin(kw, kb, fan_in, fan_out):
        bound = 1.0 / jnp.sqrt(fan_in)
        w = jax.random.uniform(kw, (fan_in, fan_out), jnp.float32, -bound, bound)
        b = jax.random.uniform(kb, (fan_out,), jnp.float32, -bound, bound)
        return w, b

    w1, b1 = lin(ks[0], ks[1], IN_FEATURES, H1)
    w2, b2 = lin(ks[2], ks[3], H1, H2)
    w3, b3 = lin(ks[4], ks[5], H2, 1)
    return (w1, b1, w2, b2, w3, b3)


def reference_forward(env_embedding, action_embedding, params):
    """Pure-JAX f32 reference for correctness check."""
    w1, b1, w2, b2, w3, b3 = params
    B, E, _ = env_embedding.shape
    A = action_embedding.shape[2]
    expanded = jnp.broadcast_to(env_embedding[:, :, None, :],
                                (B, E, A, ENV_FEATURE_SIZE))
    x = jnp.concatenate([expanded, action_embedding], axis=3).reshape(-1, IN_FEATURES)
    h1 = jax.nn.relu(x @ w1 + b1)
    h2 = jax.nn.relu(h1 @ w2 + b2)
    return (h2 @ w3 + b3).reshape(B, E, A)


if __name__ == "__main__":
    key = jax.random.PRNGKey(0)
    k_env, k_act, k_par = jax.random.split(key, 3)

    BATCH, ENGINES, ACTIONS = 2, 3, 4
    env_embedding = jax.random.normal(
        k_env, (BATCH, ENGINES, ENV_FEATURE_SIZE), jnp.float32)
    action_embedding = jax.random.normal(
        k_act, (BATCH, ENGINES, ACTIONS, ACTION_FEATURE_SIZE), jnp.float32)

    params = init_params(k_par)
    prepared = prepare_params(params)   # pad/cast weights once, outside hot path

    q = qnetwork_forward(env_embedding, action_embedding, prepared)
    q = jax.block_until_ready(q)

    q_ref = reference_forward(env_embedding, action_embedding, params)
    assert q.shape == (BATCH, ENGINES, ACTIONS)
    err = float(jnp.max(jnp.abs(q - q_ref)))
    # bf16 first-layer matmul (f32 accumulation) -> ~1e-3 abs error budget.
    assert err < 2e-2, f"mismatch vs reference: max abs err {err}"

    print("KERNEL_OK")
</pallas_src>

<mosaic_0001>
module attributes {stable_mosaic.version = 11 : i64} {
  func.func @_qnet_kernel(%arg0: i32, %arg1: memref<128x1024xf32, #tpu.memory_space<vmem>>, %arg2: memref<128x17xf32, #tpu.memory_space<vmem>>, %arg3: memref<1024x128xbf16, #tpu.memory_space<vmem>>, %arg4: memref<17x128xf32, #tpu.memory_space<vmem>>, %arg5: memref<1x128xf32, #tpu.memory_space<vmem>>, %arg6: memref<128x128xf32, #tpu.memory_space<vmem>>, %arg7: memref<1x128xf32, #tpu.memory_space<vmem>>, %arg8: memref<8x128xf32, #tpu.memory_space<vmem>>, %arg9: memref<1xf32, #tpu.memory_space<smem>>, %arg10: memref<1x1x128xf32, #tpu.memory_space<vmem>>) attributes {dimension_semantics = [#tpu.dimension_semantics<parallel>], iteration_bounds = array<i64: 1>, scalar_prefetch = 0 : i64, scratch_operands = 0 : i64, tpu.core_type = #tpu.core_type<tc>, window_params = [{transform_indices = @transform_0, window_bounds = array<i64: 128, 1024>}, {transform_indices = @transform_1, window_bounds = array<i64: 128, 17>}, {pipeline_mode = #tpu.pipeline_mode<synchronous>, transform_indices = @transform_2, window_bounds = array<i64: 1024, 128>}, {pipeline_mode = #tpu.pipeline_mode<synchronous>, transform_indices = @transform_3, window_bounds = array<i64: 17, 128>}, {pipeline_mode = #tpu.pipeline_mode<synchronous>, transform_indices = @transform_4, window_bounds = array<i64: 1, 128>}, {pipeline_mode = #tpu.pipeline_mode<synchronous>, transform_indices = @transform_5, window_bounds = array<i64: 128, 128>}, {pipeline_mode = #tpu.pipeline_mode<synchronous>, transform_indices = @transform_6, window_bounds = array<i64: 1, 128>}, {pipeline_mode = #tpu.pipeline_mode<synchronous>, transform_indices = @transform_7, window_bounds = array<i64: 8, 128>}, {transform_indices = @transform_8, window_bounds = array<i64: 1>}, {transform_indices = @transform_9, window_bounds = array<i64: 1, 1, 128>}]} {
    %c0 = arith.constant 0 : index
    %c0_0 = arith.constant 0 : index
    %0 = vector.load %arg1[%c0, %c0_0] : memref<128x1024xf32, #tpu.memory_space<vmem>>, vector<128x1024xf32>
    %1 = arith.truncf %0 : vector<128x1024xf32> to vector<128x1024xbf16>
    %c0_1 = arith.constant 0 : index
    %c0_2 = arith.constant 0 : index
    %2 = vector.load %arg3[%c0_1, %c0_2] : memref<1024x128xbf16, #tpu.memory_space<vmem>>, vector<1024x128xbf16>
    %cst = arith.constant dense<0.000000e+00> : vector<128x128xf32>
    %3 = tpu.matmul %1, %2, %cst {dimension_numbers = #tpu.dot_dimension_numbers<[1], [0], [0], [1], [0, 0, 1, 1], [], []>} : vector<128x1024xbf16>, vector<1024x128xbf16>, vector<128x128xf32> -> vector<128x128xf32>
    %c0_3 = arith.constant 0 : index
    %c0_4 = arith.constant 0 : index
    %4 = vector.load %arg2[%c0_3, %c0_4] : memref<128x17xf32, #tpu.memory_space<vmem>>, vector<128x17xf32>
    %c0_5 = arith.constant 0 : index
    %c0_6 = arith.constant 0 : index
    %5 = vector.load %arg4[%c0_5, %c0_6] : memref<17x128xf32, #tpu.memory_space<vmem>>, vector<17x128xf32>
    %cst_7 = arith.constant dense<0.000000e+00> : vector<128x128xf32>
    %6 = tpu.matmul %4, %5, %cst_7 {dimension_numbers = #tpu.dot_dimension_numbers<[1], [0], [0], [1], [0, 0, 1, 1], [], []>} : vector<128x17xf32>, vector<17x128xf32>, vector<128x128xf32> -> vector<128x128xf32>
    %7 = arith.addf %3, %6 : vector<128x128xf32>
    %c0_8 = arith.constant 0 : index
    %c0_9 = arith.constant 0 : index
    %8 = vector.load %arg5[%c0_8, %c0_9] : memref<1x128xf32, #tpu.memory_space<vmem>>, vector<1x128xf32>
    %9 = vector.broadcast %8 : vector<1x128xf32> to vector<128x128xf32>
    %10 = arith.addf %7, %9 : vector<128x128xf32>
    %cst_10 = arith.constant 0.000000e+00 : f32
    %11 = vector.broadcast %cst_10 : f32 to vector<128x128xf32>
    %12 = arith.maximumf %10, %11 : vector<128x128xf32>
    %c0_11 = arith.constant 0 : index
    %c0_12 = arith.constant 0 : index
    %13 = vector.load %arg6[%c0_11, %c0_12] : memref<128x128xf32, #tpu.memory_space<vmem>>, vector<128x128xf32>
    %cst_13 = arith.constant dense<0.000000e+00> : vector<128x128xf32>
    %14 = tpu.matmul %12, %13, %cst_13 {dimension_numbers = #tpu.dot_dimension_numbers<[1], [0], [0], [1], [0, 0, 1, 1], [], []>} : vector<128x128xf32>, vector<128x128xf32>, vector<128x128xf32> -> vector<128x128xf32>
    %c0_14 = arith.constant 0 : index
    %c0_15 = arith.constant 0 : index
    %15 = vector.load %arg7[%c0_14, %c0_15] : memref<1x128xf32, #tpu.memory_space<vmem>>, vector<1x128xf32>
    %16 = vector.broadcast %15 : vector<1x128xf32> to vector<128x128xf32>
    %17 = arith.addf %14, %16 : vector<128x128xf32>
    %cst_16 = arith.constant 0.000000e+00 : f32
    %18 = vector.broadcast %cst_16 : f32 to vector<128x128xf32>
    %19 = arith.maximumf %17, %18 : vector<128x128xf32>
    %c0_17 = arith.constant 0 : index
    %c0_18 = arith.constant 0 : index
    %20 = vector.load %arg8[%c0_17, %c0_18] : memref<8x128xf32, #tpu.memory_space<vmem>>, vector<8x128xf32>
    %cst_19 = arith.constant dense<0.000000e+00> : vector<8x128xf32>
    %21 = tpu.matmul %20, %19, %cst_19 {dimension_numbers = #tpu.dot_dimension_numbers<[1], [1], [0], [0], [0, 0, 1, 0], [], []>} : vector<8x128xf32>, vector<128x128xf32>, vector<8x128xf32> -> vector<8x128xf32>
    %22 = vector.extract_strided_slice %21 {offsets = [0, 0], sizes = [1, 128], strides = [1, 1]} : vector<8x128xf32> to vector<1x128xf32>
    %c0_20 = arith.constant 0 : index
    %23 = memref.load %arg9[%c0_20] : memref<1xf32, #tpu.memory_space<smem>>
    %24 = vector.broadcast %23 : f32 to vector<1x128xf32>
    %25 = arith.addf %22, %24 : vector<1x128xf32>
    %26 = vector.shape_cast %25 : vector<1x128xf32> to vector<1x1x128xf32>
    %c0_21 = arith.constant 0 : index
    %c0_22 = arith.constant 0 : index
    %c0_23 = arith.constant 0 : index
    %27 = vector.load %arg10[%c0_21, %c0_22, %c0_23] : memref<1x1x128xf32, #tpu.memory_space<vmem>>, vector<1x1x128xf32>
    tpu.vector_store %arg10[%c0_21, %c0_22, %c0_23], %26 {strides = array<i32>} : memref<1x1x128xf32, #tpu.memory_space<vmem>>, vector<1x1x128xf32>,
    return
  }
  func.func @transform_0(%arg0: i32) -> (i32, i32) {
    %c0_i32 = arith.constant 0 : i32
    %c0_i32_0 = arith.constant 0 : i32
    return %arg0, %c0_i32 : i32, i32
  }
  func.func @transform_1(%arg0: i32) -> (i32, i32) {
    %c0_i32 = arith.constant 0 : i32
    %c0_i32_0 = arith.constant 0 : i32
    return %arg0, %c0_i32 : i32, i32
  }
  func.func @transform_2(%arg0: i32) -> (i32, i32) {
    %c0_i32 = arith.constant 0 : i32
    %c0_i32_0 = arith.constant 0 : i32
    %c0_i32_1 = arith.constant 0 : i32
    return %c0_i32, %c0_i32_0 : i32, i32
  }
  func.func @transform_3(%arg0: i32) -> (i32, i32) {
    %c0_i32 = arith.constant 0 : i32
    %c0_i32_0 = arith.constant 0 : i32
    %c0_i32_1 = arith.constant 0 : i32
    return %c0_i32, %c0_i32_0 : i32, i32
  }
  func.func @transform_4(%arg0: i32) -> (i32, i32) {
    %c0_i32 = arith.constant 0 : i32
    %c0_i32_0 = arith.constant 0 : i32
    %c0_i32_1 = arith.constant 0 : i32
    return %c0_i32, %c0_i32_0 : i32, i32
  }
  func.func @transform_5(%arg0: i32) -> (i32, i32) {
    %c0_i32 = arith.constant 0 : i32
    %c0_i32_0 = arith.constant 0 : i32
    %c0_i32_1 = arith.constant 0 : i32
    return %c0_i32, %c0_i32_0 : i32, i32
  }
  func.func @transform_6(%arg0: i32) -> (i32, i32) {
    %c0_i32 = arith.constant 0 : i32
    %c0_i32_0 = arith.constant 0 : i32
    %c0_i32_1 = arith.constant 0 : i32
    return %c0_i32, %c0_i32_0 : i32, i32
  }
  func.func @transform_7(%arg0: i32) -> (i32, i32) {
    %c0_i32 = arith.constant 0 : i32
    %c0_i32_0 = arith.constant 0 : i32
    %c0_i32_1 = arith.constant 0 : i32
    return %c0_i32, %c0_i32_0 : i32, i32
  }
  func.func @transform_8(%arg0: i32) -> i32 {
    %c0_i32 = arith.constant 0 : i32
    %c0_i32_0 = arith.constant 0 : i32
    return %c0_i32 : i32
  }
  func.func @transform_9(%arg0: i32) -> (i32, i32, i32) {
    %c0_i32 = arith.constant 0 : i32
    %c0_i32_0 = arith.constant 0 : i32
    %c0_i32_1 = arith.constant 0 : i32
    return %arg0, %c0_i32, %c0_i32_0 : i32, i32, i32
  }
}

</mosaic_0001>

<bundles_post_ra>
// kernel: qnetwork_forward.1
= control target key start
LH: loop header
LB: loop body
LE: loop exit
PB: predicated region body
PF: predicated region fallthrough
CT: control target
= control target key end

     0   :  { %vm422_vm0 = vcmask 1040384   ;;  %vm373_vm1 = vcmask 138240   ;;  %vm2301_vm2 = vmmov 0   ;;  %s3184_s3 = inlined_call_operand.vmem [shape: f32[17,128], index: 3, kind: input, shape index: {}]   ;;  %s3185_s2 = inlined_call_operand.vmem [shape: bf16[1024,128], index: 2, kind: input, shape index: {}]   ;;  %s3186_s1 = inlined_call_operand.vmem [shape: f32[128,17], index: 1, kind: input, shape index: {}]   ;;  %s3187_s0 = inlined_call_operand.vmem [shape: f32[128,1024], index: 0, kind: input, shape index: {}]   ;;  %s3188_s5 = inlined_call_operand.vmem [shape: f32[128,128], index: 5, kind: input, shape index: {}]   ;;  %s3189_s4 = inlined_call_operand.vmem [shape: f32[1,128], index: 4, kind: input, shape index: {}]   ;;  %s3190_s6 = inlined_call_operand.vmem [shape: f32[1,128], index: 6, kind: input, shape index: {}]   ;;  %s3191_s7 = inlined_call_operand.vmem [shape: f32[8,128], index: 7, kind: input, shape index: {}]   ;;  %s3192_s8 = inlined_call_operand.<no memory space> [shape: f32[1], index: 8, kind: input, shape index: {}]   ;;  %s3193_s9 = inlined_call_operand.vmem [shape: f32[1,1,128], index: 9, kind: output, shape index: {}]  }
   0x1   :  { %v370_v0 = vld [vmem:[%s3184_s3] sm:$0xff]  ;;  %v371_v1 = vld [vmem:[%s3184_s3 + $0x8] sm:$0xff]  ;;  %v372_v5 = vld [vmem:[%s3184_s3 + $0x10] sm:$0x1] }
   0x2   :  { %v2173_v2 = vpack.c.bf16 %v371_v1, %v370_v0  ;;  %v2236_v3 = vld [vmem:[%s3185_s2 + $0x40] sm:$0xff]   ;;  %v2238_v6 = vld [vmem:[%s3185_s2 + $0x48] sm:$0xff]   ;;  %v2242_v12 = vld [vmem:[%s3185_s2 + $0x50] sm:$0xff]  }
   0x3   :  { %v2237_v4 = vld [vmem:[%s3185_s2] sm:$0xff]   ;;  %1747 = vmatprep.subr.bf16.mxu1 %v2236_v3  ;;  %v2239_v8 = vld [vmem:[%s3185_s2 + $0x8] sm:$0xff]   ;;  %v356_v13 = vld [vmem:[%s3186_s1 + $0x10] sm:$0xff] }
   0x4   :  { %2174 = vmatprep.subr.bf16.mxu0 %v2173_v2  ;;  %1748 = vmatpush3.bf16.msra.mxu1 %v2237_v4  ;;  %v354_v7 = vld [vmem:[%s3186_s1] sm:$0xff]  ;;  %v355_v9 = vld [vmem:[%s3186_s1 + $0x8] sm:$0xff]  ;;  %v2243_v14 = vld [vmem:[%s3185_s2 + $0x10] sm:$0xff]  }
   0x5   :  { %2176 = vmatpush3.bf16.msra.mxu0 %v2173_v2  ;;  %1749 = vmatprep.subr.bf16.mxu1 %v2238_v6  ;;  %v2240_v10 = vld [vmem:[%s3185_s2 + $0xc0] sm:$0xff]   ;;  %v357_v15 = vld [vmem:[%s3186_s1 + $0x18] sm:$0xff]  ;;  %v2244_v16 = vld [vmem:[%s3185_s2 + $0xc8] sm:$0xff]  }
   0x6   :  { %2056 = vmatprep.subr.msk.mxu0 %vm422_vm0, %v372_v5  ;;  %2058 = vmatprep.mubr.msk.f32.mxu0 %vm373_vm1, %v354_v7  ;;  %v2241_v11 = vld [vmem:[%s3185_s2 + $0x80] sm:$0xff]   ;;  %v2245_v17 = vld [vmem:[%s3185_s2 + $0x88] sm:$0xff]   ;;  %v2246_v18 = vld [vmem:[%s3185_s2 + $0x58] sm:$0xff]  }
   0x7   :  { %v358_v19 = vld [vmem:[%s3186_s1 + $0x20] sm:$0xff]  ;;  %v2247_v20 = vld [vmem:[%s3185_s2 + $0x18] sm:$0xff]   ;;  %v359_v21 = vld [vmem:[%s3186_s1 + $0x28] sm:$0xff] }
   0x8   :  { %1750 = vmatpush3.bf16.msra.mxu1 %v2239_v8  ;;  %v2248_v22 = vld [vmem:[%s3185_s2 + $0xd0] sm:$0xff]   ;;  %v2250_v24 = vld [vmem:[%s3185_s2 + $0x60] sm:$0xff]   ;;  %v361_v27 = vld [vmem:[%s3186_s1 + $0x38] sm:$0xff] }
   0x9   :  { %2057 = vmatpush3.msk.msra.mxu0 %vm422_vm0, %v372_v5  ;;  %1751 = vmatprep.subr.bf16.mxu1 %v2242_v12  ;;  %v2249_v23 = vld [vmem:[%s3185_s2 + $0x90] sm:$0xff]   ;;  %v2251_v26 = vld [vmem:[%s3185_s2 + $0x20] sm:$0xff]   ;;  %v2252_v28 = vld [vmem:[%s3185_s2 + $0xd8] sm:$0xff]  }
   0xa   :  { %2059 = vmatmul.mubr.msk.f32.vlgmr.msra.gmra.mrb[0].mxu0 %vm373_vm1, %v355_v9  ;;  %1811 = vmatprep.subr.bf16.mxu0 %v2240_v10  ;;  %v360_v25 = vld [vmem:[%s3186_s1 + $0x30] sm:$0xff]  ;;  %v2253_v29 = vld [vmem:[%s3185_s2 + $0x98] sm:$0xff]   ;;  %v2254_v30 = vld [vmem:[%s3185_s2 + $0x68] sm:$0xff]  }
   0xb   :  { %1812 = vmatpush3.bf16.msra.mxu0 %v2241_v11  ;;  %2061 = vmatprep.mubr.msk.f32.mxu0 %vm373_vm1, %v356_v13  ;;  %v362_v31 = vld [vmem:[%s3186_s1 + $0x40] sm:$0xff]  ;;  %v2255_v32 = vld [vmem:[%s3185_s2 + $0x28] sm:$0xff]   ;;  %v2258_v36 = vld [vmem:[%s3185_s2 + $0x70] sm:$0xff]  }
   0xc   :  { %1752 = vmatpush3.bf16.msra.mxu1 %v2243_v14  ;;  %1813 = vmatprep.subr.bf16.mxu0 %v2244_v16  ;;  %v363_v33 = vld [vmem:[%s3186_s1 + $0x48] sm:$0xff]  ;;  %v2256_v34 = vld [vmem:[%s3185_s2 + $0xe0] sm:$0xff]   ;;  %v364_v37 = vld [vmem:[%s3186_s1 + $0x50] sm:$0xff] }
   0xd   :  { %1753 = vmatprep.subr.bf16.mxu1 %v2246_v18  ;;  %v2257_v35 = vld [vmem:[%s3185_s2 + $0xa0] sm:$0xff]   ;;  %v2259_v38 = vld [vmem:[%s3185_s2 + $0x30] sm:$0xff]   ;;  %v365_v39 = vld [vmem:[%s3186_s1 + $0x58] sm:$0xff] }
   0xe   :  { %2062 = vmatmul.mubr.msk.f32.gmra.mrb[2].mxu0 %vm373_vm1, %v357_v15  ;;  %v2260_v40 = vld [vmem:[%s3185_s2 + $0xe8] sm:$0xff]   ;;  %v2262_v42 = vld [vmem:[%s3185_s2 + $0x78] sm:$0xff]   ;;  %v366_v43 = vld [vmem:[%s3186_s1 + $0x60] sm:$0xff] }
   0xf   :  { %1814 = vmatpush3.bf16.msra.mxu0 %v2245_v17  ;;  %2064 = vmatprep.mubr.msk.f32.mxu0 %vm373_vm1, %v358_v19  ;;  %v2261_v41 = vld [vmem:[%s3185_s2 + $0xa8] sm:$0xff]   ;;  %v2263_v44 = vld [vmem:[%s3185_s2 + $0x38] sm:$0xff]   ;;  %v2264_v46 = vld [vmem:[%s3185_s2 + $0xf0] sm:$0xff]  }
  0x10   :  { %1754 = vmatpush3.bf16.msra.mxu1 %v2247_v20  ;;  %1815 = vmatprep.subr.bf16.mxu0 %v2248_v22  ;;  %v367_v45 = vld [vmem:[%s3186_s1 + $0x68] sm:$0xff]  ;;  %v2265_v50 = vld [vmem:[%s3185_s2 + $0xb0] sm:$0xff]   ;;  %v34_v51 = vld [vmem:[%s3187_s0] sm:$0xff] }
  0x11   :  { %1755 = vmatprep.subr.bf16.mxu1 %v2250_v24  ;;  %v35_v47 = vld [vmem:[%s3187_s0 + $0x8] sm:$0xff]  ;;  %v42_v52 = vld [vmem:[%s3187_s0 + $0x40] sm:$0xff]  ;;  %v368_v54 = vld [vmem:[%s3186_s1 + $0x70] sm:$0xff] }
  0x12   :  { %2065 = vmatmul.mubr.msk.f32.gmra.mrb[4].mxu0 %vm373_vm1, %v359_v21  ;;  %v43_v48 = vld [vmem:[%s3187_s0 + $0x48] sm:$0xff]  ;;  %v162_v53 = vpack.c.bf16 %v42_v52, %v34_v51  ;;  %v369_v55 = vld [vmem:[%s3186_s1 + $0x78] sm:$0xff]  ;;  %v2268_v58 = vld [vmem:[%s3185_s2 + $0x140] sm:$0xff]  }
  0x13   :  { %1816 = vmatpush3.bf16.msra.mxu0 %v2249_v23  ;;  %2067 = vmatprep.mubr.msk.f32.mxu0 %vm373_vm1, %v360_v25  ;;  %v163_v49 = vpack.c.bf16 %v43_v48, %v35_v47  ;;  %v2266_v56 = vld [vmem:[%s3185_s2 + $0xf8] sm:$0xff]   ;;  %v2269_v62 = vld [vmem:[%s3185_s2 + $0x100] sm:$0xff]   ;;  %v36_v63 = vld [vmem:[%s3187_s0 + $0x10] sm:$0xff] }
  0x14   :  { %1756 = vmatpush3.bf16.msra.mxu1 %v2251_v26  ;;  %1817 = vmatprep.subr.bf16.mxu0 %v2252_v28  ;;  %v2267_v57 = vld [vmem:[%s3185_s2 + $0xb8] sm:$0xff]   ;;  %v44_v0 = vld [vmem:[%s3187_s0 + $0x50] sm:$0xff]  ;;  %v2270_v2 = vld [vmem:[%s3185_s2 + $0x1c0] sm:$0xff]  }
  0x15   :  { %1757 = vmatprep.subr.bf16.mxu1 %v2254_v30  ;;  %987 = vmatprep.mubr.bf16.mxu1 %v163_v49  ;;  %v37_v59 = vld [vmem:[%s3187_s0 + $0x18] sm:$0xff]  ;;  %v164_v1 = vpack.c.bf16 %v44_v0, %v36_v63  ;;  %v51_v3 = vld [vmem:[%s3187_s0 + $0x88] sm:$0xff]  ;;  %v2271_v6 = vld [vmem:[%s3185_s2 + $0x180] sm:$0xff]  }
  0x16   :  { %2068 = vmatmul.mubr.msk.f32.gmra.mrb[6].mxu0 %vm373_vm1, %v361_v27  ;;  %v45_v60 = vld [vmem:[%s3187_s0 + $0x58] sm:$0xff]  ;;  %v59_v4 = vld [vmem:[%s3187_s0 + $0xc8] sm:$0xff]  ;;  %v50_v7 = vld [vmem:[%s3187_s0 + $0x80] sm:$0xff] }
  0x17   :  { %1818 = vmatpush3.bf16.msra.mxu0 %v2253_v29  ;;  %2070 = vmatprep.mubr.msk.f32.mxu0 %vm373_vm1, %v362_v31  ;;  %v165_v61 = vpack.c.bf16 %v45_v60, %v37_v59  ;;  %v171_v5 = vpack.c.bf16 %v59_v4, %v51_v3  ;;  %v58_v8 = vld [vmem:[%s3187_s0 + $0xc0] sm:$0xff]  ;;  %v2272_v10 = vld [vmem:[%s3185_s2 + $0x148] sm:$0xff]   ;;  %v53_v11 = vld [vmem:[%s3187_s0 + $0x98] sm:$0xff] }
  0x18   :  { %1758 = vmatpush3.bf16.msra.mxu1 %v2255_v32  ;;  %1819 = vmatprep.subr.bf16.mxu0 %v2256_v34  ;;  %v170_v9 = vpack.c.bf16 %v58_v8, %v50_v7  ;;  %v61_v12 = vld [vmem:[%s3187_s0 + $0xd8] sm:$0xff]  ;;  %v2273_v14 = vld [vmem:[%s3185_s2 + $0x108] sm:$0xff]   ;;  %v52_v15 = vld [vmem:[%s3187_s0 + $0x90] sm:$0xff] }
  0x19   :  { %1759 = vmatprep.subr.bf16.mxu1 %v2258_v36  ;;  %v173_v13 = vpack.c.bf16 %v61_v12, %v53_v11  ;;  %v60_v16 = vld [vmem:[%s3187_s0 + $0xd0] sm:$0xff]  ;;  %v2274_v18 = vld [vmem:[%s3185_s2 + $0x1c8] sm:$0xff]   ;;  %v66_v23 = vld [vmem:[%s3187_s0 + $0x100] sm:$0xff] }
  0x1a   :  { %2071 = vmatmul.mubr.msk.f32.gmra.mrb[8].mxu0 %vm373_vm1, %v363_v33  ;;  %v172_v17 = vpack.c.bf16 %v60_v16, %v52_v15  ;;  %v67_v19 = vld [vmem:[%s3187_s0 + $0x108] sm:$0xff]  ;;  %v74_v24 = vld [vmem:[%s3187_s0 + $0x140] sm:$0xff]  ;;  %v2276_v26 = vld [vmem:[%s3185_s2 + $0x150] sm:$0xff]  }
  0x1b   :  { %1820 = vmatpush3.bf16.msra.mxu0 %v2257_v35  ;;  %2073 = vmatprep.mubr.msk.f32.mxu0 %vm373_vm1, %v364_v37  ;;  %v75_v20 = vld [vmem:[%s3187_s0 + $0x148] sm:$0xff]  ;;  %v178_v25 = vpack.c.bf16 %v74_v24, %v66_v23  ;;  %v69_v27 = vld [vmem:[%s3187_s0 + $0x118] sm:$0xff]  ;;  %v2277_v30 = vld [vmem:[%s3185_s2 + $0x110] sm:$0xff]  }
  0x1c   :  { %1760 = vmatpush3.bf16.msra.mxu1 %v2259_v38  ;;  %1821 = vmatprep.subr.bf16.mxu0 %v2260_v40  ;;  %v179_v21 = vpack.c.bf16 %v75_v20, %v67_v19  ;;  %v2275_v22 = vld [vmem:[%s3185_s2 + $0x188] sm:$0xff]   ;;  %v77_v28 = vld [vmem:[%s3187_s0 + $0x158] sm:$0xff]  ;;  %v68_v31 = vld [vmem:[%s3187_s0 + $0x110] sm:$0xff] }
  0x1d   :  { %1761 = vmatprep.subr.bf16.mxu1 %v2262_v42  ;;  %v181_v29 = vpack.c.bf16 %v77_v28, %v69_v27  ;;  %v76_v32 = vld [vmem:[%s3187_s0 + $0x150] sm:$0xff]  ;;  %v83_v35 = vld [vmem:[%s3187_s0 + $0x188] sm:$0xff]  ;;  %v90_v40 = vld [vmem:[%s3187_s0 + $0x1c0] sm:$0xff] }
  0x1e   :  { %2074 = vmatmul.mubr.msk.f32.gmra.mrb[10].mxu0 %vm373_vm1, %v365_v39  ;;  %v180_v33 = vpack.c.bf16 %v76_v32, %v68_v31  ;;  %v2278_v34 = vld [vmem:[%s3185_s2 + $0x1d0] sm:$0xff]   ;;  %v91_v36 = vld [vmem:[%s3187_s0 + $0x1c8] sm:$0xff]  ;;  %v82_v39 = vld [vmem:[%s3187_s0 + $0x180] sm:$0xff] }
  0x1f   :  { %1822 = vmatpush3.bf16.msra.mxu0 %v2261_v41  ;;  %2076 = vmatprep.mubr.msk.f32.mxu0 %vm373_vm1, %v366_v43  ;;  %v187_v37 = vpack.c.bf16 %v91_v36, %v83_v35  ;;  %v2279_v38 = vld [vmem:[%s3185_s2 + $0x190] sm:$0xff]   ;;  %v2280_v41 = vld [vmem:[%s3185_s2 + $0x158] sm:$0xff]   ;;  %v186_v43 = vpack.c.bf16 %v90_v40, %v82_v39  ;;  %v107_v51 = vld [vmem:[%s3187_s0 + $0x248] sm:$0xff] }
  0x20   :  { %1762 = vmatpush3.bf16.msra.mxu1 %v2263_v44  ;;  %1823 = vmatprep.subr.bf16.mxu0 %v2264_v46  ;;  %v85_v42 = vld [vmem:[%s3187_s0 + $0x198] sm:$0xff]  ;;  %v84_v47 = vld [vmem:[%s3187_s0 + $0x190] sm:$0xff]  ;;  %v123_v3 = vld [vmem:[%s3187_s0 + $0x2c8] sm:$0xff] }
  0x21   :  { %1875 = vmatprep.subr.bf16.mxu1 %v2268_v58  ;;  %v93_v44 = vld [vmem:[%s3187_s0 + $0x1d8] sm:$0xff]  ;;  %v92_v48 = vld [vmem:[%s3187_s0 + $0x1d0] sm:$0xff]  ;;  %v122_v7 = vld [vmem:[%s3187_s0 + $0x2c0] sm:$0xff] }
  0x22   :  { %2077 = vmatmul.mubr.msk.f32.gmra.mrb[12].mxu0 %vm373_vm1, %v367_v45  ;;  %v189_v45 = vpack.c.bf16 %v93_v44, %v85_v42  ;;  %v2281_v46 = vld [vmem:[%s3185_s2 + $0x118] sm:$0xff]   ;;  %v188_v52 = vpack.c.bf16 %v92_v48, %v84_v47  ;;  %v100_v63 = vld [vmem:[%s3187_s0 + $0x210] sm:$0xff]  ;;  %v139_v19 = vld [vmem:[%s3187_s0 + $0x348] sm:$0xff] }
  0x23   :  { %1824 = vmatpush3.bf16.msra.mxu0 %v2265_v50  ;;  %988 = vmatmul.mubr.bf16.vlgmr.msra.gmra.mrb[0].mxu1 %v162_v53  ;;  %v2282_v49 = vld [vmem:[%s3185_s2 + $0x1d8] sm:$0xff]   ;;  %v99_v50 = vld [vmem:[%s3187_s0 + $0x208] sm:$0xff]  ;;  %v108_v0 = vld [vmem:[%s3187_s0 + $0x250] sm:$0xff] }
  0x24   :  { %2079 = vmatprep.mubr.msk.f32.mxu0 %vm373_vm1, %v368_v54  ;;  %1825 = vmatprep.subr.bf16.mxu0 %v2266_v56  ;;  %v195_v53 = vpack.c.bf16 %v107_v51, %v99_v50  ;;  %v2283_v54 = vld [vmem:[%s3185_s2 + $0x198] sm:$0xff]   ;;  %v106_v56 = vld [vmem:[%s3187_s0 + $0x240] sm:$0xff]  ;;  %v196_v8 = vpack.c.bf16 %v108_v0, %v100_v63  ;;  %v124_v15 = vld [vmem:[%s3187_s0 + $0x2d0] sm:$0xff] }
  0x25   :  { %1876 = vmatpush3.bf16.msra.mxu1 %v2269_v62  ;;  %995 = vmatprep.mubr.bf16.mxu1 %v171_v5  ;;  %v101_v58 = vld [vmem:[%s3187_s0 + $0x218] sm:$0xff]  ;;  %v2287_v5 = vld [vmem:[%s3185_s2 + $0x1a0] sm:$0xff]   ;;  %v147_v31 = vld [vmem:[%s3187_s0 + $0x388] sm:$0xff] }
  0x26   :  { %2080 = vmatmul.mubr.msk.f32.gmra.mrb[14].mxu0 %vm373_vm1, %v369_v55  ;;  %1877 = vmatprep.subr.bf16.mxu1 %v2272_v10  ;;  %v98_v55 = vld [vmem:[%s3187_s0 + $0x200] sm:$0xff]  ;;  %v109_v59 = vld [vmem:[%s3187_s0 + $0x258] sm:$0xff]  ;;  %v155_v32 = vld [vmem:[%s3187_s0 + $0x3c8] sm:$0xff] }
  0x27   :  { %1826 = vmatpush3.bf16.msra.mxu0 %v2267_v57  ;;  %1084 = vmatprep.mubr.bf16.mxu0 %v165_v61  ;;  %v2284_v57 = vld [vmem:[%s3185_s2 + $0x160] sm:$0xff]   ;;  %v197_v60 = vpack.c.bf16 %v109_v59, %v101_v58  ;;  %v194_v62 = vpack.c.bf16 %v106_v56, %v98_v55  ;;  %v117_v10 = vld [vmem:[%s3187_s0 + $0x298] sm:$0xff]  ;;  %v2295_v35 = vld [vmem:[%s3185_s2 + $0x1b0] sm:$0xff]  }
  0x28   :  { %1939 = vmatprep.subr.bf16.mxu0 %v2270_v2  ;;  %v2285_v61 = vld [vmem:[%s3185_s2 + $0x120] sm:$0xff]   ;;  %v115_v2 = vld [vmem:[%s3187_s0 + $0x288] sm:$0xff]  ;;  %v125_v11 = vld [vmem:[%s3187_s0 + $0x2d8] sm:$0xff] }
  0x29   :  { %1878 = vmatpush3.bf16.msra.mxu1 %v2273_v14  ;;  %v203_v4 = vpack.c.bf16 %v123_v3, %v115_v2  ;;  %v205_v12 = vpack.c.bf16 %v125_v11, %v117_v10  ;;  %v116_v14 = vld [vmem:[%s3187_s0 + $0x290] sm:$0xff]  ;;  %v133_v23 = vld [vmem:[%s3187_s0 + $0x318] sm:$0xff]  ;;  %v138_v27 = vld [vmem:[%s3187_s0 + $0x340] sm:$0xff] }
  0x2a   :  { %1085 = vmatmul.mubr.bf16.vlgmr.msra.gmra.mrb[16].mxu0 %v164_v1  ;;  %1879 = vmatprep.subr.bf16.mxu1 %v2276_v26  ;;  %v2286_v1 = vld [vmem:[%s3185_s2 + $0x1e0] sm:$0xff]   ;;  %v204_v24 = vpack.c.bf16 %v124_v15, %v116_v14  ;;  %v140_v36 = vld [vmem:[%s3187_s0 + $0x350] sm:$0xff]  ;;  %v149_v39 = vld [vmem:[%s3187_s0 + $0x398] sm:$0xff] }
  0x2b   :  { %1940 = vmatpush3.bf16.msra.mxu0 %v2271_v6  ;;  %996 = vmatmul.mubr.bf16.gmra.mrb[4].mxu1 %v170_v9  ;;  %v114_v6 = vld [vmem:[%s3187_s0 + $0x280] sm:$0xff]  ;;  %v2288_v9 = vld [vmem:[%s3185_s2 + $0x168] sm:$0xff]   ;;  %v157_v40 = vld [vmem:[%s3187_s0 + $0x3d8] sm:$0xff] }
  0x2c   :  { %1092 = vmatprep.mubr.bf16.mxu0 %v173_v13  ;;  %1941 = vmatprep.subr.bf16.mxu0 %v2274_v18  ;;  %v2289_v13 = vld [vmem:[%s3185_s2 + $0x128] sm:$0xff]   ;;  %v202_v16 = vpack.c.bf16 %v122_v7, %v114_v6  ;;  %v130_v26 = vld [vmem:[%s3187_s0 + $0x300] sm:$0xff]  ;;  %v148_v51 = vld [vmem:[%s3187_s0 + $0x390] sm:$0xff] }
  0x2d   :  { %1003 = vmatprep.mubr.bf16.mxu1 %v179_v21  ;;  %1880 = vmatpush3.bf16.msra.mxu1 %v2277_v30  ;;  %v131_v18 = vld [vmem:[%s3187_s0 + $0x308] sm:$0xff]  ;;  %v2294_v30 = vld [vmem:[%s3185_s2 + $0x1f0] sm:$0xff]   ;;  %v154_v44 = vld [vmem:[%s3187_s0 + $0x3c0] sm:$0xff] }
  0x2e   :  { %1881 = vmatprep.subr.bf16.mxu1 %v2280_v41  ;;  %v211_v20 = vpack.c.bf16 %v139_v19, %v131_v18  ;;  %v2291_v21 = vld [vmem:[%s3185_s2 + $0x1a8] sm:$0xff]   ;;  %v2297_v41 = vld [vmem:[%s3185_s2 + $0x138] sm:$0xff]   ;;  %v46_v58 = vld [vmem:[%s3187_s0 + $0x60] sm:$0xff] }
  0x2f   :  { %1942 = vmatpush3.bf16.msra.mxu0 %v2275_v22  ;;  %v2292_v22 = vld [vmem:[%s3185_s2 + $0x170] sm:$0xff]   ;;  %v39_v47 = vld [vmem:[%s3187_s0 + $0x28] sm:$0xff]  ;;  %v49_v55 = vld [vmem:[%s3187_s0 + $0x78] sm:$0xff] }
  0x30   :  { %1943 = vmatprep.subr.bf16.mxu0 %v2278_v34  ;;  %v132_v34 = vld [vmem:[%s3187_s0 + $0x310] sm:$0xff]  ;;  %v47_v48 = vld [vmem:[%s3187_s0 + $0x68] sm:$0xff]  ;;  %v57_v2 = vld [vmem:[%s3187_s0 + $0xb8] sm:$0xff] }
  0x31   :  { %1882 = vmatpush3.bf16.msra.mxu1 %v2281_v46  ;;  %v212_v42 = vpack.c.bf16 %v140_v36, %v132_v34  ;;  %v2298_v46 = vld [vmem:[%s3185_s2 + $0x1f8] sm:$0xff]   ;;  %v40_v63 = vld [vmem:[%s3187_s0 + $0x30] sm:$0xff]  ;;  %v62_v6 = vld [vmem:[%s3187_s0 + $0xe0] sm:$0xff] }
  0x32   :  { %1093 = vmatmul.mubr.bf16.gmra.mrb[20].mxu0 %v172_v17  ;;  %1883 = vmatprep.subr.bf16.mxu1 %v2284_v57  ;;  %v2290_v17 = vld [vmem:[%s3185_s2 + $0x1e8] sm:$0xff]   ;;  %v38_v57 = vld [vmem:[%s3187_s0 + $0x20] sm:$0xff]  ;;  %v48_v0 = vld [vmem:[%s3187_s0 + $0x70] sm:$0xff] }
  0x33   :  { %1004 = vmatmul.mubr.bf16.gmra.mrb[8].mxu1 %v178_v25  ;;  %1100 = vmatprep.mubr.bf16.mxu0 %v181_v29  ;;  %v141_v25 = vld [vmem:[%s3187_s0 + $0x358] sm:$0xff]  ;;  %v2293_v29 = vld [vmem:[%s3185_s2 + $0x130] sm:$0xff]   ;;  %v78_v18 = vld [vmem:[%s3187_s0 + $0x160] sm:$0xff] }
  0x34   :  { %1011 = vmatprep.mubr.bf16.mxu1 %v187_v37  ;;  %1944 = vmatpush3.bf16.msra.mxu0 %v2279_v38  ;;  %v213_v28 = vpack.c.bf16 %v141_v25, %v133_v23  ;;  %v219_v37 = vpack.c.bf16 %v155_v32, %v147_v31  ;;  %v2296_v38 = vld [vmem:[%s3185_s2 + $0x178] sm:$0xff]   ;;  %v56_v11 = vld [vmem:[%s3187_s0 + $0xb0] sm:$0xff]  ;;  %v103_v32 = vld [vmem:[%s3187_s0 + $0x228] sm:$0xff] }
  0x35   :  { %1945 = vmatprep.subr.bf16.mxu0 %v2282_v49  ;;  %1884 = vmatpush3.bf16.msra.mxu1 %v2285_v61  ;;  %v2299_v49 = vld [vmem:[%s3185_s2 + $0x1b8] sm:$0xff]   ;;  %v63_v61 = vld [vmem:[%s3187_s0 + $0xe8] sm:$0xff]  ;;  %v72_v23 = vld [vmem:[%s3187_s0 + $0x130] sm:$0xff] }
  0x36   :  { %1885 = vmatprep.subr.bf16.mxu1 %v2288_v9  ;;  %v65_v3 = vld [vmem:[%s3187_s0 + $0xf8] sm:$0xff]  ;;  %v79_v9 = vld [vmem:[%s3187_s0 + $0x168] sm:$0xff]  ;;  %v96_v36 = vld [vmem:[%s3187_s0 + $0x1f0] sm:$0xff] }
  0x37   :  { %v177_v7 = vpack.c.bf16 %v65_v3, %v57_v2  ;;  %v73_v14 = vld [vmem:[%s3187_s0 + $0x138] sm:$0xff]  ;;  %v1383_v2 = vld [vmem:[%s3188_s5 + $0x8] sm:$0xff]  ;;  %v134_v3 = vld [vmem:[%s3187_s0 + $0x320] sm:$0xff] }
  0x38   :  { %1946 = vmatpush3.bf16.msra.mxu0 %v2283_v54  ;;  %v41_v54 = vld [vmem:[%s3187_s0 + $0x38] sm:$0xff] }
  0x39   :  { %1947 = vmatprep.subr.bf16.mxu0 %v2286_v1  ;;  %1886 = vmatpush3.bf16.msra.mxu1 %v2289_v13  ;;  %v169_v59 = vpack.c.bf16 %v49_v55, %v41_v54  ;;  %v81_v15 = vld [vmem:[%s3187_s0 + $0x178] sm:$0xff]  ;;  %v126_v54 = vld [vmem:[%s3187_s0 + $0x2e0] sm:$0xff] }
  0x3a   :  { %1101 = vmatmul.mubr.bf16.gmra.mrb[24].mxu0 %v180_v33  ;;  %1887 = vmatprep.subr.bf16.mxu1 %v2292_v22  ;;  %v210_v33 = vpack.c.bf16 %v138_v27, %v130_v26  ;;  %v185_v19 = vpack.c.bf16 %v81_v15, %v73_v14  ;;  %v89_v26 = vld [vmem:[%s3187_s0 + $0x1b8] sm:$0xff]  ;;  %v1384_v15 = vld [vmem:[%s3188_s5 + $0x10] sm:$0xff] }
  0x3b   :  { %1108 = vmatprep.mubr.bf16.mxu0 %v189_v45  ;;  %1012 = vmatmul.mubr.bf16.gmra.mrb[12].mxu1 %v186_v43  ;;  %v146_v43 = vld [vmem:[%s3187_s0 + $0x380] sm:$0xff]  ;;  %v221_v45 = vpack.c.bf16 %v157_v40, %v149_v39  ;;  %v97_v27 = vld [vmem:[%s3187_s0 + $0x1f8] sm:$0xff] }
  0x3c   :  { %1019 = vmatprep.mubr.bf16.mxu1 %v195_v53  ;;  %1948 = vmatpush3.bf16.msra.mxu0 %v2287_v5  ;;  %v218_v50 = vpack.c.bf16 %v154_v44, %v146_v43  ;;  %v167_v53 = vpack.c.bf16 %v47_v48, %v39_v47  ;;  %v54_v5 = vld [vmem:[%s3187_s0 + $0xa0] sm:$0xff]  ;;  %v193_v31 = vpack.c.bf16 %v97_v27, %v89_v26  ;;  %v113_v39 = vld [vmem:[%s3187_s0 + $0x278] sm:$0xff]  ;;  %v119_v44 = vld [vmem:[%s3187_s0 + $0x2a8] sm:$0xff] }
  0x3d   :  { %1949 = vmatprep.subr.bf16.mxu0 %v2290_v17  ;;  %1888 = vmatpush3.bf16.msra.mxu1 %v2293_v29  ;;  %v174_v10 = vpack.c.bf16 %v62_v6, %v54_v5  ;;  %v70_v17 = vld [vmem:[%s3187_s0 + $0x120] sm:$0xff]  ;;  %v104_v47 = vld [vmem:[%s3187_s0 + $0x230] sm:$0xff]  ;;  %v161_v14 = vld [vmem:[%s3187_s0 + $0x3f8] sm:$0xff] }
  0x3e   :  { %1889 = vmatprep.subr.bf16.mxu1 %v2296_v38  ;;  %v182_v22 = vpack.c.bf16 %v78_v18, %v70_v17  ;;  %v86_v29 = vld [vmem:[%s3187_s0 + $0x1a0] sm:$0xff]  ;;  %v105_v38 = vld [vmem:[%s3187_s0 + $0x238] sm:$0xff]  ;;  %v112_v48 = vld [vmem:[%s3187_s0 + $0x270] sm:$0xff] }
  0x3f   :  { %v201_v43 = vpack.c.bf16 %v113_v39, %v105_v38  ;;  %v1387_v26 = vld [vmem:[%s3188_s5 + $0x28] sm:$0xff]  ;;  %v1394_v38 = vld [vmem:[%s3188_s5 + $0x60] sm:$0xff] }
  0x40   :  { %1950 = vmatpush3.bf16.msra.mxu0 %v2291_v21  ;;  %v95_v21 = vld [vmem:[%s3187_s0 + $0x1e8] sm:$0xff] }
  0x41   :  { %1951 = vmatprep.subr.bf16.mxu0 %v2294_v30  ;;  %1890 = vmatpush3.bf16.msra.mxu1 %v2297_v41  ;;  %v94_v30 = vld [vmem:[%s3187_s0 + $0x1e0] sm:$0xff]  ;;  %v1395_v39 = vld [vmem:[%s3188_s5 + $0x68] sm:$0xff] }
  0x42   :  { %1109 = vmatmul.mubr.bf16.gmra.mrb[28].mxu0 %v188_v52  ;;  %v156_v52 = vld [vmem:[%s3187_s0 + $0x3d0] sm:$0xff]  ;;  %v190_v34 = vpack.c.bf16 %v94_v30, %v86_v29  ;;  %v102_v41 = vld [vmem:[%s3187_s0 + $0x220] sm:$0xff]  ;;  %v1389_v30 = vld [vmem:[%s3188_s5 + $0x38] sm:$0xff] }
  0x43   :  { %1116 = vmatprep.mubr.bf16.mxu0 %v197_v60  ;;  %1020 = vmatmul.mubr.bf16.gmra.mrb[16].mxu1 %v194_v62  ;;  %v220_v56 = vpack.c.bf16 %v156_v52, %v148_v51  ;;  %v55_v60 = vld [vmem:[%s3187_s0 + $0xa8] sm:$0xff]  ;;  %v166_v62 = vpack.c.bf16 %v46_v58, %v38_v57  ;;  %v129_v51 = vld [vmem:[%s3187_s0 + $0x2f8] sm:$0xff]  ;;  %v200_v52 = vpack.c.bf16 %v112_v48, %v104_v47  ;;  %v1388_v29 = vld [vmem:[%s3188_s5 + $0x30] sm:$0xff] }
  0x44   :  { %1027 = vmatprep.mubr.bf16.mxu1 %v203_v4  ;;  %1952 = vmatpush3.bf16.msra.mxu0 %v2295_v35  ;;  %v175_v1 = vpack.c.bf16 %v63_v61, %v55_v60  ;;  %v168_v4 = vpack.c.bf16 %v48_v0, %v40_v63  ;;  %v88_v35 = vld [vmem:[%s3187_s0 + $0x1b0] sm:$0xff]  ;;  %v143_v57 = vld [vmem:[%s3187_s0 + $0x368] sm:$0xff]  ;;  %v145_v63 = vld [vmem:[%s3187_s0 + $0x378] sm:$0xff] }
  0x45   :  { %1953 = vmatprep.subr.bf16.mxu0 %v2298_v46  ;;  %v192_v40 = vpack.c.bf16 %v96_v36, %v88_v35  ;;  %v128_v60 = vld [vmem:[%s3187_s0 + $0x2f0] sm:$0xff]  ;;  %v1393_v36 = vld [vmem:[%s3188_s5 + $0x58] sm:$0xff] }
  0x46   :  { %v1392_v35 = vld [vmem:[%s3188_s5 + $0x50] sm:$0xff] }
  0x48   :  { %1954 = vmatpush3.bf16.msra.mxu0 %v2299_v49 }
  0x4a   :  { %1117 = vmatmul.mubr.bf16.gmra.mrb[32].mxu0 %v196_v8  ;;  %v71_v8 = vld [vmem:[%s3187_s0 + $0x128] sm:$0xff] }
  0x4b   :  { %1124 = vmatprep.mubr.bf16.mxu0 %v205_v12  ;;  %1028 = vmatmul.mubr.bf16.gmra.mrb[20].mxu1 %v202_v16  ;;  %v64_v12 = vld [vmem:[%s3187_s0 + $0xf0] sm:$0xff]  ;;  %v183_v13 = vpack.c.bf16 %v79_v9, %v71_v8  ;;  %v159_v8 = vld [vmem:[%s3187_s0 + $0x3e8] sm:$0xff] }
  0x4c   :  { %1035 = vmatprep.mubr.bf16.mxu1 %v211_v20  ;;  %v176_v16 = vpack.c.bf16 %v64_v12, %v56_v11  ;;  %v87_v20 = vld [vmem:[%s3187_s0 + $0x1a8] sm:$0xff]  ;;  %v144_v11 = vld [vmem:[%s3187_s0 + $0x370] sm:$0xff] }
  0x4d   :  { %v191_v25 = vpack.c.bf16 %v95_v21, %v87_v20  ;;  %v158_v20 = vld [vmem:[%s3187_s0 + $0x3e0] sm:$0xff] }
  0x52   :  { %1125 = vmatmul.mubr.bf16.gmra.mrb[36].mxu0 %v204_v24  ;;  %v80_v24 = vld [vmem:[%s3187_s0 + $0x170] sm:$0xff] }
  0x53   :  { %1132 = vmatprep.mubr.bf16.mxu0 %v213_v28  ;;  %1036 = vmatmul.mubr.bf16.gmra.mrb[24].mxu1 %v210_v33  ;;  %v184_v28 = vpack.c.bf16 %v80_v24, %v72_v23  ;;  %v111_v33 = vld [vmem:[%s3187_s0 + $0x268] sm:$0xff]  ;;  %v152_v23 = vld [vmem:[%s3187_s0 + $0x3b0] sm:$0xff] }
  0x54   :  { %1043 = vmatprep.mubr.bf16.mxu1 %v219_v37  ;;  %v199_v37 = vpack.c.bf16 %v111_v33, %v103_v32  ;;  %v160_v24 = vld [vmem:[%s3187_s0 + $0x3f0] sm:$0xff]  ;;  %v1390_v32 = vld [vmem:[%s3188_s5 + $0x40] sm:$0xff]  ;;  %v1391_v33 = vld [vmem:[%s3188_s5 + $0x48] sm:$0xff] }
  0x55   :  { %v224_v27 = vpack.c.bf16 %v160_v24, %v152_v23 }
  0x5a   :  { %1133 = vmatmul.mubr.bf16.gmra.mrb[40].mxu0 %v212_v42  ;;  %v110_v42 = vld [vmem:[%s3187_s0 + $0x260] sm:$0xff] }
  0x5b   :  { %1140 = vmatprep.mubr.bf16.mxu0 %v221_v45  ;;  %1044 = vmatmul.mubr.bf16.gmra.mrb[28].mxu1 %v218_v50  ;;  %v127_v45 = vld [vmem:[%s3187_s0 + $0x2e8] sm:$0xff]  ;;  %v198_v46 = vpack.c.bf16 %v110_v42, %v102_v41  ;;  %v121_v50 = vld [vmem:[%s3187_s0 + $0x2b8] sm:$0xff]  ;;  %v1396_v41 = vld [vmem:[%s3188_s5 + $0x70] sm:$0xff] }
  0x5c   :  { %1181 = vmatprep.mubr.bf16.mxu1 %v167_v53  ;;  %v207_v49 = vpack.c.bf16 %v127_v45, %v119_v44  ;;  %v118_v53 = vld [vmem:[%s3187_s0 + $0x2a0] sm:$0xff]  ;;  %v209_v55 = vpack.c.bf16 %v129_v51, %v121_v50  ;;  %v1397_v42 = vld [vmem:[%s3188_s5 + $0x78] sm:$0xff] }
  0x5d   :  { %v206_v58 = vpack.c.bf16 %v126_v54, %v118_v53 }
  0x62   :  { %1141 = vmatmul.mubr.bf16.gmra.mrb[44].mxu0 %v220_v56  ;;  %v135_v56 = vld [vmem:[%s3187_s0 + $0x328] sm:$0xff] }
  0x63   :  { %1278 = vmatprep.mubr.bf16.mxu0 %v169_v59  ;;  %1182 = vmatmul.mubr.bf16.vlgmr.msra.gmra.mrb[32].mxu1 %v166_v62  ;;  %v120_v59 = vld [vmem:[%s3187_s0 + $0x2b0] sm:$0xff]  ;;  %v215_v61 = vpack.c.bf16 %v143_v57, %v135_v56  ;;  %v137_v62 = vld [vmem:[%s3187_s0 + $0x338] sm:$0xff] }
  0x64   :  { %1189 = vmatprep.mubr.bf16.mxu1 %v175_v1  ;;  %v208_v0 = vpack.c.bf16 %v128_v60, %v120_v59  ;;  %v1382_v1 = vld [vmem:[%s3188_s5] sm:$0xff]  ;;  %v217_v5 = vpack.c.bf16 %v145_v63, %v137_v62 }
  0x65   :  { %v2177_v6 = vpack.c.bf16 %v1383_v2, %v1382_v1 }
  0x67   :  { %2178 = vmatprep.subr.bf16.mxu1 %v2177_v6 }
  0x68   :  { %2180 = vmatpush3.bf16.msra.mxu1 %v2177_v6 }
  0x6a   :  { %1279 = vmatmul.mubr.bf16.vlgmr.msra.gmra.mrb[48].mxu0 %v168_v4  ;;  %v142_v4 = vld [vmem:[%s3187_s0 + $0x360] sm:$0xff] }
  0x6b   :  { %1286 = vmatprep.mubr.bf16.mxu0 %v177_v7  ;;  %1190 = vmatmul.mubr.bf16.gmra.mrb[36].mxu1 %v174_v10  ;;  %v151_v7 = vld [vmem:[%s3187_s0 + $0x3a8] sm:$0xff]  ;;  %v214_v9 = vpack.c.bf16 %v142_v4, %v134_v3  ;;  %v136_v10 = vld [vmem:[%s3187_s0 + $0x330] sm:$0xff] }
  0x6c   :  { %1197 = vmatprep.mubr.bf16.mxu1 %v183_v13  ;;  %v223_v12 = vpack.c.bf16 %v159_v8, %v151_v7  ;;  %v153_v13 = vld [vmem:[%s3187_s0 + $0x3b8] sm:$0xff]  ;;  %v216_v17 = vpack.c.bf16 %v144_v11, %v136_v10 }
  0x6d   :  { %v225_v21 = vpack.c.bf16 %v161_v14, %v153_v13 }
  0x72   :  { %1287 = vmatmul.mubr.bf16.gmra.mrb[52].mxu0 %v176_v16  ;;  %v1385_v16 = vld [vmem:[%s3188_s5 + $0x18] sm:$0xff] }
  0x73   :  { %1294 = vmatprep.mubr.bf16.mxu0 %v185_v19  ;;  %1198 = vmatmul.mubr.bf16.gmra.mrb[40].mxu1 %v182_v22  ;;  %v2181_v18 = vpack.c.bf16 %v1385_v16, %v1384_v15  ;;  %v150_v19 = vld [vmem:[%s3187_s0 + $0x3a0] sm:$0xff] }
  0x74   :  { %1205 = vmatprep.mubr.bf16.mxu1 %v191_v25  ;;  %v222_v22 = vpack.c.bf16 %v158_v20, %v150_v19  ;;  %v1386_v25 = vld [vmem:[%s3188_s5 + $0x20] sm:$0xff] }
  0x75   :  { %2182 = vmatprep.subr.bf16.mxu1 %v2181_v18 }
  0x76   :  { %2184 = vmatpush3.bf16.msra.mxu1 %v2181_v18 }
  0x7a   :  { %1295 = vmatmul.mubr.bf16.gmra.mrb[56].mxu0 %v184_v28  ;;  %v2185_v28 = vpack.c.bf16 %v1387_v26, %v1386_v25 }
  0x7b   :  { %1302 = vmatprep.mubr.bf16.mxu0 %v193_v31  ;;  %1206 = vmatmul.mubr.bf16.gmra.mrb[44].mxu1 %v190_v34  ;;  %v2189_v31 = vpack.c.bf16 %v1389_v30, %v1388_v29  ;;  %v2193_v34 = vpack.c.bf16 %v1391_v33, %v1390_v32 }
  0x7c   :  { %1213 = vmatprep.mubr.bf16.mxu1 %v199_v37  ;;  %2186 = vmatprep.subr.bf16.mxu1 %v2185_v28  ;;  %v2197_v37 = vpack.c.bf16 %v1393_v36, %v1392_v35 }
  0x7d   :  { %2188 = vmatpush3.bf16.msra.mxu1 %v2185_v28 }
  0x7e   :  { %2190 = vmatprep.subr.bf16.mxu1 %v2189_v31 }
  0x81   :  { %2192 = vmatpush3.bf16.msra.mxu1 %v2189_v31 }
  0x82   :  { %1303 = vmatmul.mubr.bf16.gmra.mrb[60].mxu0 %v192_v40  ;;  %2194 = vmatprep.subr.bf16.mxu1 %v2193_v34  ;;  %v2201_v40 = vpack.c.bf16 %v1395_v39, %v1394_v38 }
  0x83   :  { %1310 = vmatprep.mubr.bf16.mxu0 %v201_v43  ;;  %1214 = vmatmul.mubr.bf16.gmra.mrb[48].mxu1 %v198_v46  ;;  %v2205_v43 = vpack.c.bf16 %v1397_v42, %v1396_v41 }
  0x84   :  { %1221 = vmatprep.mubr.bf16.mxu1 %v207_v49 }
  0x85   :  { %2196 = vmatpush3.bf16.msra.mxu1 %v2193_v34 }
  0x86   :  { %2198 = vmatprep.subr.bf16.mxu1 %v2197_v37 }
  0x89   :  { %2200 = vmatpush3.bf16.msra.mxu1 %v2197_v37 }
  0x8a   :  { %1311 = vmatmul.mubr.bf16.gmra.mrb[64].mxu0 %v200_v52  ;;  %2202 = vmatprep.subr.bf16.mxu1 %v2201_v40 }
  0x8b   :  { %1318 = vmatprep.mubr.bf16.mxu0 %v209_v55  ;;  %1222 = vmatmul.mubr.bf16.gmra.mrb[52].mxu1 %v206_v58 }
  0x8c   :  { %1229 = vmatprep.mubr.bf16.mxu1 %v215_v61 }
  0x8d   :  { %2204 = vmatpush3.bf16.msra.mxu1 %v2201_v40 }
  0x8e   :  { %2206 = vmatprep.subr.bf16.mxu1 %v2205_v43 }
  0x91   :  { %2208 = vmatpush3.bf16.msra.mxu1 %v2205_v43 }
  0x92   :  { %1319 = vmatmul.mubr.bf16.gmra.mrb[68].mxu0 %v208_v0 }
  0x93   :  { %1326 = vmatprep.mubr.bf16.mxu0 %v217_v5  ;;  %1230 = vmatmul.mubr.bf16.gmra.mrb[56].mxu1 %v214_v9 }
  0x94   :  { %1237 = vmatprep.mubr.bf16.mxu1 %v223_v12 }
  0x9a   :  { %1327 = vmatmul.mubr.bf16.gmra.mrb[72].mxu0 %v216_v17 }
  0x9b   :  { %1334 = vmatprep.mubr.bf16.mxu0 %v225_v21  ;;  %1238 = vmatmul.mubr.bf16.gmra.mrb[60].mxu1 %v222_v22 }
  0xa2   :  { %1335 = vmatmul.mubr.bf16.gmra.mrb[76].mxu0 %v224_v27 }
  0xdd   :  { %v2060_v44 = vpop.f32.mrb[0].mxu0 }
  0xde   :  { %v492_v45 = vpop.f32.mrb[1].mxu0 }
  0xe1   :  { %v2063_v46 = vpop.f32.mrb[2].mxu0 }
  0xe2   :  { %v502_v47 = vpop.f32.mrb[3].mxu0 }
  0xe5   :  { %v2066_v48 = vpop.f32.mrb[4].mxu0 }
  0xe6   :  { %v512_v49 = vpop.f32.mrb[5].mxu0 }
  0xe9   :  { %v3050_v50 = vpop.f32.mrb[6].mxu0 }
  0xea   :  { %v522_v51 = vpop.f32.mrb[7].mxu0 }
  0xed   :  { %v3052_v52 = vpop.f32.mrb[8].mxu0 }
  0xee   :  { %v3054_v53 = vpop.f32.mrb[9].mxu0 }
  0xf1   :  { %v3056_v54 = vpop.f32.mrb[10].mxu0 }
  0xf2   :  { %v3058_v55 = vpop.f32.mrb[11].mxu0 }
  0xf5   :  { %v3060_v56 = vpop.f32.mrb[12].mxu0 }
  0xf6   :  { %v3062_v57 = vpop.f32.mrb[13].mxu0  ;;  %v1763_v58 = vpop.f32.mrb[0].mxu1 }
  0xf7   :  { %v1764_v59 = vpop.f32.mrb[1].mxu1 }
  0xf8   :  { %v1765_v61 = vadd.f32 %v1764_v59, %v1763_v58  ;;  %v1766_v62 = vpop.f32.mrb[2].mxu1 }
  0xf9   :  { %v3064_v60 = vpop.f32.mrb[14].mxu0  ;;  %v1767_v0 = vpop.f32.mrb[3].mxu1 }
  0xfa   :  { %v3066_v63 = vpop.f32.mrb[15].mxu0  ;;  %v990_v1 = vadd.f32 %v1765_v61, %v492_v45  ;;  %v1768_v2 = vadd.f32 %v1767_v0, %v1766_v62 }
  0xfc   :  { %v993_v3 = vadd.f32 %v2060_v44, %v1768_v2 }
  0xfd   :  { %v1827_v4 = vpop.f32.mrb[16].mxu0 }
  0xfe   :  { %v1828_v5 = vpop.f32.mrb[17].mxu0  ;;  %v1769_v10 = vpop.f32.mrb[4].mxu1 }
  0xff   :  { %v1829_v6 = vadd.f32 %v1828_v5, %v1827_v4  ;;  %v1830_v7 = vpop.f32.mrb[18].mxu0  ;;  %v1770_v12 = vpop.f32.mrb[5].mxu1 }
 0x100   :  { %v1831_v8 = vpop.f32.mrb[19].mxu0  ;;  %v1771_v13 = vadd.f32 %v1770_v12, %v1769_v10  ;;  %v1772_v15 = vpop.f32.mrb[6].mxu1 }
 0x101   :  { %v3068_v9 = vadd.f32 %v1829_v6, %v990_v1  ;;  %v1832_v11 = vadd.f32 %v1831_v8, %v1830_v7  ;;  %v1773_v16 = vpop.f32.mrb[7].mxu1 }
 0x102   :  { %v998_v17 = vadd.f32 %v1771_v13, %v502_v47  ;;  %v1774_v18 = vadd.f32 %v1773_v16, %v1772_v15 }
 0x103   :  { %v3070_v14 = vadd.f32 %v1832_v11, %v993_v3 }
 0x104   :  { %v1001_v21 = vadd.f32 %v2063_v46, %v1774_v18 }
 0x105   :  { %v1833_v19 = vpop.f32.mrb[20].mxu0 }
 0x106   :  { %v1834_v20 = vpop.f32.mrb[21].mxu0  ;;  %v1775_v26 = vpop.f32.mrb[8].mxu1 }
 0x107   :  { %v1835_v22 = vadd.f32 %v1834_v20, %v1833_v19  ;;  %v1836_v23 = vpop.f32.mrb[22].mxu0  ;;  %v1776_v28 = vpop.f32.mrb[9].mxu1 }
 0x108   :  { %v1837_v24 = vpop.f32.mrb[23].mxu0  ;;  %v1777_v29 = vadd.f32 %v1776_v28, %v1775_v26  ;;  %v1778_v31 = vpop.f32.mrb[10].mxu1 }
 0x109   :  { %v3072_v25 = vadd.f32 %v1835_v22, %v998_v17  ;;  %v1838_v27 = vadd.f32 %v1837_v24, %v1836_v23  ;;  %v1779_v32 = vpop.f32.mrb[11].mxu1 }
 0x10a   :  { %v1006_v33 = vadd.f32 %v1777_v29, %v512_v49  ;;  %v1780_v34 = vadd.f32 %v1779_v32, %v1778_v31 }
 0x10b   :  { %v3074_v30 = vadd.f32 %v1838_v27, %v1001_v21 }
 0x10c   :  { %v1009_v37 = vadd.f32 %v2066_v48, %v1780_v34 }
 0x10d   :  { %v1839_v35 = vpop.f32.mrb[24].mxu0 }
 0x10e   :  { %v1840_v36 = vpop.f32.mrb[25].mxu0  ;;  %v1781_v42 = vpop.f32.mrb[12].mxu1 }
 0x10f   :  { %v1841_v38 = vadd.f32 %v1840_v36, %v1839_v35  ;;  %v1842_v39 = vpop.f32.mrb[26].mxu0  ;;  %v1782_v44 = vpop.f32.mrb[13].mxu1 }
 0x110   :  { %v1843_v40 = vpop.f32.mrb[27].mxu0  ;;  %v1783_v45 = vadd.f32 %v1782_v44, %v1781_v42  ;;  %v1784_v47 = vpop.f32.mrb[14].mxu1 }
 0x111   :  { %v3076_v41 = vadd.f32 %v1841_v38, %v1006_v33  ;;  %v1844_v43 = vadd.f32 %v1843_v40, %v1842_v39  ;;  %v1785_v58 = vpop.f32.mrb[15].mxu1 }
 0x112   :  { %v1014_v59 = vadd.f32 %v1783_v45, %v522_v51  ;;  %v1786_v61 = vadd.f32 %v1785_v58, %v1784_v47 }
 0x113   :  { %v3078_v46 = vadd.f32 %v1844_v43, %v1009_v37 }
 0x114   :  { %v1017_v0 = vadd.f32 %v3050_v50, %v1786_v61 }
 0x115   :  { %v1845_v49 = vpop.f32.mrb[28].mxu0 }
 0x116   :  { %v1846_v62 = vpop.f32.mrb[29].mxu0  ;;  %v1787_v4 = vpop.f32.mrb[16].mxu1 }
 0x117   :  { %v1847_v48 = vadd.f32 %v1846_v62, %v1845_v49  ;;  %v1848_v1 = vpop.f32.mrb[30].mxu0  ;;  %v1788_v6 = vpop.f32.mrb[17].mxu1 }
 0x118   :  { %v1849_v2 = vpop.f32.mrb[31].mxu0  ;;  %v1789_v7 = vadd.f32 %v1788_v6, %v1787_v4  ;;  %v1790_v10 = vpop.f32.mrb[18].mxu1 }
 0x119   :  { %v3081_v3 = vadd.f32 %v1847_v48, %v1014_v59  ;;  %v1850_v5 = vadd.f32 %v1849_v2, %v1848_v1  ;;  %v1791_v11 = vpop.f32.mrb[19].mxu1 }
 0x11a   :  { %v1022_v51 = vadd.f32 %v1789_v7, %v3054_v53  ;;  %v1792_v12 = vadd.f32 %v1791_v11, %v1790_v10 }
 0x11b   :  { %v3083_v8 = vadd.f32 %v1850_v5, %v1017_v0 }
 0x11c   :  { %v1025_v50 = vadd.f32 %v3052_v52, %v1792_v12 }
 0x11d   :  { %v1851_v13 = vpop.f32.mrb[32].mxu0 }
 0x11e   :  { %v1852_v15 = vpop.f32.mrb[33].mxu0  ;;  %v1793_v20 = vpop.f32.mrb[20].mxu1 }
 0x11f   :  { %v1853_v16 = vadd.f32 %v1852_v15, %v1851_v13  ;;  %v1854_v17 = vpop.f32.mrb[34].mxu0  ;;  %v1794_v22 = vpop.f32.mrb[21].mxu1 }
 0x120   :  { %v1855_v18 = vpop.f32.mrb[35].mxu0  ;;  %v1795_v23 = vadd.f32 %v1794_v22, %v1793_v20  ;;  %v1796_v26 = vpop.f32.mrb[22].mxu1 }
 0x121   :  { %v3087_v19 = vadd.f32 %v1853_v16, %v1022_v51  ;;  %v1856_v21 = vadd.f32 %v1855_v18, %v1854_v17  ;;  %v1797_v27 = vpop.f32.mrb[23].mxu1 }
 0x122   :  { %v1030_v53 = vadd.f32 %v1795_v23, %v3058_v55  ;;  %v1798_v28 = vadd.f32 %v1797_v27, %v1796_v26 }
 0x123   :  { %v3089_v24 = vadd.f32 %v1856_v21, %v1025_v50 }
 0x124   :  { %v1033_v52 = vadd.f32 %v3056_v54, %v1798_v28 }
 0x125   :  { %v1857_v29 = vpop.f32.mrb[36].mxu0 }
 0x126   :  { %v1858_v31 = vpop.f32.mrb[37].mxu0  ;;  %v1799_v36 = vpop.f32.mrb[24].mxu1 }
 0x127   :  { %v1859_v32 = vadd.f32 %v1858_v31, %v1857_v29  ;;  %v1860_v33 = vpop.f32.mrb[38].mxu0  ;;  %v1800_v38 = vpop.f32.mrb[25].mxu1  ;;  %v3114_v29 = vld [vmem:[%s3189_s4] ss:$0 sm:$0xff] }
 0x128   :  { %v1861_v34 = vpop.f32.mrb[39].mxu0  ;;  %v1801_v39 = vadd.f32 %v1800_v38, %v1799_v36  ;;  %v1802_v42 = vpop.f32.mrb[26].mxu1 }
 0x129   :  { %v3093_v35 = vadd.f32 %v1859_v32, %v1030_v53  ;;  %v1862_v37 = vadd.f32 %v1861_v34, %v1860_v33  ;;  %v1803_v43 = vpop.f32.mrb[27].mxu1 }
 0x12a   :  { %v1038_v55 = vadd.f32 %v1801_v39, %v3062_v57  ;;  %v1804_v44 = vadd.f32 %v1803_v43, %v1802_v42 }
 0x12b   :  { %v3095_v40 = vadd.f32 %v1862_v37, %v1033_v52 }
 0x12c   :  { %v1041_v54 = vadd.f32 %v3060_v56, %v1804_v44 }
 0x12d   :  { %v1863_v45 = vpop.f32.mrb[40].mxu0 }
 0x12e   :  { %v1864_v47 = vpop.f32.mrb[41].mxu0  ;;  %v1805_v62 = vpop.f32.mrb[28].mxu1 }
 0x12f   :  { %v1865_v58 = vadd.f32 %v1864_v47, %v1863_v45  ;;  %v1866_v59 = vpop.f32.mrb[42].mxu0  ;;  %v1806_v48 = vpop.f32.mrb[29].mxu1 }
 0x130   :  { %v1867_v61 = vpop.f32.mrb[43].mxu0  ;;  %v1807_v1 = vadd.f32 %v1806_v48, %v1805_v62  ;;  %v1808_v4 = vpop.f32.mrb[30].mxu1 }
 0x131   :  { %v3099_v49 = vadd.f32 %v1865_v58, %v1038_v55  ;;  %v1868_v0 = vadd.f32 %v1867_v61, %v1866_v59  ;;  %v1809_v5 = vpop.f32.mrb[31].mxu1 }
 0x132   :  { %v1046_v57 = vadd.f32 %v1807_v1, %v3066_v63  ;;  %v1810_v6 = vadd.f32 %v1809_v5, %v1808_v4 }
 0x133   :  { %v3101_v2 = vadd.f32 %v1868_v0, %v1041_v54 }
 0x134   :  { %v1049_v56 = vadd.f32 %v3064_v60, %v1810_v6 }
 0x135   :  { %v1869_v7 = vpop.f32.mrb[44].mxu0 }
 0x136   :  { %v1870_v10 = vpop.f32.mrb[45].mxu0  ;;  %v1891_v15 = vpop.f32.mrb[32].mxu1 }
 0x137   :  { %v1871_v11 = vadd.f32 %v1870_v10, %v1869_v7  ;;  %v1872_v51 = vpop.f32.mrb[46].mxu0  ;;  %v1892_v16 = vpop.f32.mrb[33].mxu1 }
 0x138   :  { %v1873_v12 = vpop.f32.mrb[47].mxu0  ;;  %v1893_v18 = vadd.f32 %v1892_v16, %v1891_v15  ;;  %v1894_v20 = vpop.f32.mrb[34].mxu1 }
 0x139   :  { %v3105_v13 = vadd.f32 %v1871_v11, %v1046_v57  ;;  %v1874_v50 = vadd.f32 %v1873_v12, %v1872_v51  ;;  %v1895_v21 = vpop.f32.mrb[35].mxu1 }
 0x13a   :  { %v1184_v63 = vadd.f32 %v1893_v18, %v3068_v9  ;;  %v1896_v22 = vadd.f32 %v1895_v21, %v1894_v20 }
 0x13b   :  { %v3107_v17 = vadd.f32 %v1874_v50, %v1049_v56 }
 0x13c   :  { %v1187_v60 = vadd.f32 %v1896_v22, %v3070_v14 }
 0x13d   :  { %v1955_v23 = vpop.f32.mrb[48].mxu0 }
 0x13e   :  { %v1956_v26 = vpop.f32.mrb[49].mxu0  ;;  %v1897_v52 = vpop.f32.mrb[36].mxu1 }
 0x13f   :  { %v1957_v27 = vadd.f32 %v1956_v26, %v1955_v23  ;;  %v1958_v53 = vpop.f32.mrb[50].mxu0  ;;  %v1898_v33 = vpop.f32.mrb[37].mxu1 }
 0x140   :  { %v1959_v28 = vpop.f32.mrb[51].mxu0  ;;  %v1899_v34 = vadd.f32 %v1898_v33, %v1897_v52  ;;  %v1900_v9 = vpop.f32.mrb[38].mxu1 }
 0x141   :  { %v1281_v31 = vadd.f32 %v1957_v27, %v1184_v63  ;;  %v1960_v32 = vadd.f32 %v1959_v28, %v1958_v53  ;;  %v1901_v38 = vpop.f32.mrb[39].mxu1 }
 0x142   :  { %v1192_v14 = vadd.f32 %v1899_v34, %v3072_v25  ;;  %v1902_v42 = vadd.f32 %v1901_v38, %v1900_v9 }
 0x143   :  { %v1284_v36 = vadd.f32 %v1960_v32, %v1187_v60  ;;  %v1350_v37 = vadd.f32 %v3114_v29, %v1281_v31 }
 0x144   :  { %v1195_v47 = vadd.f32 %v1902_v42, %v3074_v30 }
 0x145   :  { %v1351_v39 = vadd.f32 %v3114_v29, %v1284_v36  ;;  %v1961_v43 = vpop.f32.mrb[52].mxu0  ;;  %v1366_v55 = vmax.f32 %v1350_v37, 0.0 }
 0x146   :  { %v1962_v44 = vpop.f32.mrb[53].mxu0  ;;  %v1903_v62 = vpop.f32.mrb[40].mxu1 }
 0x147   :  { %v1367_v45 = vmax.f32 %v1351_v39, 0.0  ;;  %v1963_v54 = vadd.f32 %v1962_v44, %v1961_v43  ;;  %v1964_v58 = vpop.f32.mrb[54].mxu0  ;;  %2114 = vmatprep.mubr.f32.mxu1 %v1366_v55  ;;  %v1904_v48 = vpop.f32.mrb[41].mxu1 }
 0x148   :  { %v1965_v59 = vpop.f32.mrb[55].mxu0  ;;  %v1905_v1 = vadd.f32 %v1904_v48, %v1903_v62  ;;  %v1906_v4 = vpop.f32.mrb[42].mxu1 }
 0x149   :  { %v1289_v61 = vadd.f32 %v1963_v54, %v1192_v14  ;;  %v1966_v0 = vadd.f32 %v1965_v59, %v1964_v58  ;;  %2115 = vmatmul.mubr.f32.vlgmr.msra.gmra.mrb[64].mxu1 %v1367_v45  ;;  %v1907_v57 = vpop.f32.mrb[43].mxu1 }
 0x14a   :  { %v1200_v6 = vadd.f32 %v1905_v1, %v3076_v41  ;;  %v1908_v7 = vadd.f32 %v1907_v57, %v1906_v4 }
 0x14b   :  { %v1292_v25 = vadd.f32 %v1966_v0, %v1195_v47  ;;  %v1352_v5 = vadd.f32 %v3114_v29, %v1289_v61 }
 0x14c   :  { %v1203_v51 = vadd.f32 %v1908_v7, %v3078_v46 }
 0x14d   :  { %v1967_v10 = vpop.f32.mrb[56].mxu0  ;;  %v1368_v30 = vmax.f32 %v1352_v5, 0.0  ;;  %v1353_v56 = vadd.f32 %v3114_v29, %v1292_v25 }
 0x14e   :  { %v1968_v11 = vpop.f32.mrb[57].mxu0  ;;  %v1909_v20 = vpop.f32.mrb[44].mxu1 }
 0x14f   :  { %v1969_v12 = vadd.f32 %v1968_v11, %v1967_v10  ;;  %v1970_v15 = vpop.f32.mrb[58].mxu0  ;;  %2117 = vmatprep.mubr.f32.mxu1 %v1368_v30  ;;  %v1369_v50 = vmax.f32 %v1353_v56, 0.0  ;;  %v1910_v63 = vpop.f32.mrb[45].mxu1 }
 0x150   :  { %v1971_v16 = vpop.f32.mrb[59].mxu0  ;;  %v1911_v22 = vadd.f32 %v1910_v63, %v1909_v20  ;;  %v1912_v23 = vpop.f32.mrb[46].mxu1 }
 0x151   :  { %v1297_v18 = vadd.f32 %v1969_v12, %v1200_v6  ;;  %v1972_v21 = vadd.f32 %v1971_v16, %v1970_v15  ;;  %2118 = vmatmul.mubr.f32.gmra.mrb[66].mxu1 %v1369_v50  ;;  %v1913_v60 = vpop.f32.mrb[47].mxu1 }
 0x152   :  { %v1208_v27 = vadd.f32 %v1911_v22, %v3081_v3  ;;  %v1914_v53 = vadd.f32 %v1913_v60, %v1912_v23 }
 0x153   :  { %v1300_v41 = vadd.f32 %v1972_v21, %v1203_v51  ;;  %v1354_v26 = vadd.f32 %v3114_v29, %v1297_v18 }
 0x154   :  { %v1211_v32 = vadd.f32 %v1914_v53, %v3083_v8 }
 0x155   :  { %v1973_v46 = vpop.f32.mrb[60].mxu0  ;;  %v1370_v28 = vmax.f32 %v1354_v26, 0.0  ;;  %v1355_v31 = vadd.f32 %v3114_v29, %v1300_v41 }
 0x156   :  { %v1974_v52 = vpop.f32.mrb[61].mxu0  ;;  %v1915_v38 = vpop.f32.mrb[48].mxu1 }
 0x157   :  { %v1975_v33 = vadd.f32 %v1974_v52, %v1973_v46  ;;  %v1976_v34 = vpop.f32.mrb[62].mxu0  ;;  %2120 = vmatprep.mubr.f32.mxu1 %v1370_v28  ;;  %v1371_v36 = vmax.f32 %v1355_v31, 0.0  ;;  %v1916_v39 = vpop.f32.mrb[49].mxu1 }
 0x158   :  { %v1977_v9 = vpop.f32.mrb[63].mxu0  ;;  %v1917_v42 = vadd.f32 %v1916_v39, %v1915_v38  ;;  %v1918_v43 = vpop.f32.mrb[50].mxu1 }
 0x159   :  { %v1305_v37 = vadd.f32 %v1975_v33, %v1208_v27  ;;  %v1978_v14 = vadd.f32 %v1977_v9, %v1976_v34  ;;  %2121 = vmatmul.mubr.f32.gmra.mrb[68].mxu1 %v1371_v36  ;;  %v1919_v44 = vpop.f32.mrb[51].mxu1 }
 0x15a   :  { %v1216_v45 = vadd.f32 %v1917_v42, %v3087_v19  ;;  %v1920_v47 = vadd.f32 %v1919_v44, %v1918_v43 }
 0x15b   :  { %v1308_v3 = vadd.f32 %v1978_v14, %v1211_v32  ;;  %v1356_v55 = vadd.f32 %v3114_v29, %v1305_v37 }
 0x15c   :  { %v1219_v61 = vadd.f32 %v1920_v47, %v3089_v24 }
 0x15d   :  { %v1979_v8 = vpop.f32.mrb[64].mxu0  ;;  %v1372_v54 = vmax.f32 %v1356_v55, 0.0  ;;  %v1357_v58 = vadd.f32 %v3114_v29, %v1308_v3 }
 0x15e   :  { %v1980_v59 = vpop.f32.mrb[65].mxu0  ;;  %v1921_v4 = vpop.f32.mrb[52].mxu1 }
 0x15f   :  { %v1981_v62 = vadd.f32 %v1980_v59, %v1979_v8  ;;  %v1982_v0 = vpop.f32.mrb[66].mxu0  ;;  %2123 = vmatprep.mubr.f32.mxu1 %v1372_v54  ;;  %v1373_v48 = vmax.f32 %v1357_v58, 0.0  ;;  %v1922_v57 = vpop.f32.mrb[53].mxu1 }
 0x160   :  { %v1983_v1 = vpop.f32.mrb[67].mxu0  ;;  %v1923_v6 = vadd.f32 %v1922_v57, %v1921_v4  ;;  %v1924_v7 = vpop.f32.mrb[54].mxu1 }
 0x161   :  { %v1313_v25 = vadd.f32 %v1981_v62, %v1216_v45  ;;  %v1984_v5 = vadd.f32 %v1983_v1, %v1982_v0  ;;  %2124 = vmatmul.mubr.f32.gmra.mrb[70].mxu1 %v1373_v48  ;;  %v1925_v30 = vpop.f32.mrb[55].mxu1 }
 0x162   :  { %v1224_v56 = vadd.f32 %v1923_v6, %v3093_v35  ;;  %v1926_v11 = vadd.f32 %v1925_v30, %v1924_v7  ;;  %v3150_v7 = vld [vmem:[%s3190_s6] ss:$0 sm:$0xff] }
 0x163   :  { %v1316_v19 = vadd.f32 %v1984_v5, %v1219_v61  ;;  %v1358_v10 = vadd.f32 %v3114_v29, %v1313_v25 }
 0x164   :  { %v1227_v50 = vadd.f32 %v1926_v11, %v3095_v40 }
 0x165   :  { %v1985_v24 = vpop.f32.mrb[68].mxu0  ;;  %v1374_v51 = vmax.f32 %v1358_v10, 0.0  ;;  %v1359_v12 = vadd.f32 %v3114_v29, %v1316_v19  ;;  %v2300_v19 = vmov 0.0|0.0  }
 0x166   :  { %v1986_v15 = vpop.f32.mrb[69].mxu0  ;;  %v1927_v22 = vpop.f32.mrb[56].mxu1  ;;  %2209 = vmatprep.subr.bf16.mxu0 %v2300_v19 }
 0x167   :  { %v1987_v16 = vadd.f32 %v1986_v15, %v1985_v24  ;;  %v1988_v18 = vpop.f32.mrb[70].mxu0  ;;  %2126 = vmatprep.mubr.f32.mxu1 %v1374_v51  ;;  %v1375_v20 = vmax.f32 %v1359_v12, 0.0  ;;  %v1928_v23 = vpop.f32.mrb[57].mxu1 }
 0x168   :  { %v1989_v21 = vpop.f32.mrb[71].mxu0  ;;  %v1929_v26 = vadd.f32 %v1928_v23, %v1927_v22  ;;  %v1930_v60 = vpop.f32.mrb[58].mxu1 }
 0x169   :  { %v1321_v63 = vadd.f32 %v1987_v16, %v1224_v56  ;;  %v1990_v41 = vadd.f32 %v1989_v21, %v1988_v18  ;;  %2127 = vmatmul.mubr.f32.gmra.mrb[72].mxu1 %v1375_v20  ;;  %v1931_v53 = vpop.f32.mrb[59].mxu1 }
 0x16a   :  { %v1232_v46 = vadd.f32 %v1929_v26, %v3099_v49  ;;  %v1932_v28 = vadd.f32 %v1931_v53, %v1930_v60 }
 0x16b   :  { %v1324_v35 = vadd.f32 %v1990_v41, %v1227_v50  ;;  %v1360_v27 = vadd.f32 %v3114_v29, %v1321_v63 }
 0x16c   :  { %v1235_v33 = vadd.f32 %v1932_v28, %v3101_v2 }
 0x16d   :  { %v1991_v40 = vpop.f32.mrb[72].mxu0  ;;  %v1376_v31 = vmax.f32 %v1360_v27, 0.0  ;;  %v1361_v52 = vadd.f32 %v3114_v29, %v1324_v35 }
 0x16e   :  { %v1992_v32 = vpop.f32.mrb[73].mxu0  ;;  %v1933_v14 = vpop.f32.mrb[60].mxu1 }
 0x16f   :  { %v1993_v34 = vadd.f32 %v1992_v32, %v1991_v40  ;;  %v1994_v36 = vpop.f32.mrb[74].mxu0  ;;  %2129 = vmatprep.mubr.f32.mxu1 %v1376_v31  ;;  %v1377_v9 = vmax.f32 %v1361_v52, 0.0  ;;  %v1934_v42 = vpop.f32.mrb[61].mxu1 }
 0x170   :  { %v1995_v37 = vpop.f32.mrb[75].mxu0  ;;  %v1935_v3 = vadd.f32 %v1934_v42, %v1933_v14  ;;  %v1936_v43 = vpop.f32.mrb[62].mxu1 }
 0x171   :  { %v1329_v38 = vadd.f32 %v1993_v34, %v1232_v46  ;;  %v1996_v39 = vadd.f32 %v1995_v37, %v1994_v36  ;;  %2130 = vmatmul.mubr.f32.gmra.mrb[74].mxu1 %v1377_v9  ;;  %v1937_v44 = vpop.f32.mrb[63].mxu1 }
 0x172   :  { %v1240_v45 = vadd.f32 %v1935_v3, %v3105_v13  ;;  %v1938_v47 = vadd.f32 %v1937_v44, %v1936_v43 }
 0x173   :  { %v1332_v49 = vadd.f32 %v1996_v39, %v1235_v33  ;;  %v1362_v55 = vadd.f32 %v3114_v29, %v1329_v38 }
 0x174   :  { %v1243_v59 = vadd.f32 %v1938_v47, %v3107_v17  ;;  %v2302_v17 = vmov 0.0  }
 0x175   :  { %v1997_v2 = vpop.f32.mrb[76].mxu0  ;;  %v1378_v8 = vmax.f32 %v1362_v55, 0.0  ;;  %v1363_v54 = vadd.f32 %v3114_v29, %v1332_v49  ;;  %2170 = vmatprep.mubr.msk.f32.mxu0 %vm2301_vm2, %v2302_v17 }
 0x176   :  { %v1998_v58 = vpop.f32.mrb[77].mxu0 }
 0x177   :  { %v1999_v61 = vadd.f32 %v1998_v58, %v1997_v2  ;;  %v2000_v62 = vpop.f32.mrb[78].mxu0  ;;  %2132 = vmatprep.mubr.f32.mxu1 %v1378_v8  ;;  %v1379_v0 = vmax.f32 %v1363_v54, 0.0 }
 0x178   :  { %v2001_v48 = vpop.f32.mrb[79].mxu0 }
 0x179   :  { %v1337_v1 = vadd.f32 %v1999_v61, %v1240_v45  ;;  %v2002_v25 = vadd.f32 %v2001_v48, %v2000_v62  ;;  %2133 = vmatmul.mubr.f32.gmra.mrb[76].mxu1 %v1379_v0 }
 0x17b   :  { %v1340_v4 = vadd.f32 %v2002_v25, %v1243_v59  ;;  %v1364_v5 = vadd.f32 %v3114_v29, %v1337_v1 }
 0x17d   :  { %v1380_v13 = vmax.f32 %v1364_v5, 0.0  ;;  %v1365_v57 = vadd.f32 %v3114_v29, %v1340_v4  ;;  %v1566_v4 = vld [vmem:[%s3191_s7] sm:$0xff]  ;;  %v1638_v5 = vstv %s3192_s8 }
 0x17f   :  { %2135 = vmatprep.mubr.f32.mxu1 %v1380_v13  ;;  %v1381_v6 = vmax.f32 %v1365_v57, 0.0 }
 0x181   :  { %2136 = vmatmul.mubr.f32.gmra.mrb[78].mxu1 %v1381_v6 }
 0x21c   :  { %v2116_v10 = vpop.f32.mrb[64].mxu1 }
 0x21d   :  { %v1477_v30 = vadd.f32 %v2116_v10, %v3150_v7  ;;  %v1471_v56 = vpop.f32.mrb[65].mxu1 }
 0x21e   :  { %v1472_v29 = vadd.f32 %v3150_v7, %v1471_v56 }
 0x21f   :  { %v1551_v11 = vmax.f32 %v1477_v30, 0.0 }
 0x220   :  { %v1550_v24 = vmax.f32 %v1472_v29, 0.0 }
 0x222   :  { %v2210_v51 = vpack.c.bf16 %v1551_v11, %v1550_v24 }
 0x224   :  { %v2119_v12 = vpop.f32.mrb[66].mxu1  ;;  %2211 = vmatpush3.bf16.xpose.msra.mxu0 %v2210_v51 }
 0x225   :  { %v1487_v15 = vadd.f32 %v2119_v12, %v3150_v7  ;;  %v1481_v50 = vpop.f32.mrb[67].mxu1  ;;  %2212 = vmatprep.subr.bf16.mxu0 %v2300_v19 }
 0x226   :  { %v1482_v16 = vadd.f32 %v3150_v7, %v1481_v50 }
 0x227   :  { %v1553_v18 = vmax.f32 %v1487_v15, 0.0 }
 0x228   :  { %v1552_v20 = vmax.f32 %v1482_v16, 0.0 }
 0x22a   :  { %v2213_v21 = vpack.c.bf16 %v1553_v18, %v1552_v20 }
 0x22c   :  { %v2122_v63 = vpop.f32.mrb[68].mxu1  ;;  %2214 = vmatpush3.bf16.xpose.msra.mxu0 %v2213_v21 }
 0x22d   :  { %v1497_v22 = vadd.f32 %v2122_v63, %v3150_v7  ;;  %v1491_v41 = vpop.f32.mrb[69].mxu1  ;;  %2215 = vmatprep.subr.bf16.mxu0 %v2300_v19 }
 0x22e   :  { %v1492_v23 = vadd.f32 %v3150_v7, %v1491_v41 }
 0x22f   :  { %v1555_v26 = vmax.f32 %v1497_v22, 0.0 }
 0x230   :  { %v1554_v35 = vmax.f32 %v1492_v23, 0.0 }
 0x232   :  { %v2216_v60 = vpack.c.bf16 %v1555_v26, %v1554_v35 }
 0x234   :  { %v2125_v27 = vpop.f32.mrb[70].mxu1  ;;  %2217 = vmatpush3.bf16.xpose.msra.mxu0 %v2216_v60 }
 0x235   :  { %v1507_v53 = vadd.f32 %v2125_v27, %v3150_v7  ;;  %v1501_v46 = vpop.f32.mrb[71].mxu1  ;;  %2218 = vmatprep.subr.bf16.mxu0 %v2300_v19 }
 0x236   :  { %v1502_v28 = vadd.f32 %v3150_v7, %v1501_v46 }
 0x237   :  { %v1557_v40 = vmax.f32 %v1507_v53, 0.0 }
 0x238   :  { %v1556_v31 = vmax.f32 %v1502_v28, 0.0 }
 0x23a   :  { %v2219_v52 = vpack.c.bf16 %v1557_v40, %v1556_v31 }
 0x23c   :  { %v2128_v32 = vpop.f32.mrb[72].mxu1  ;;  %2220 = vmatpush3.bf16.xpose.msra.mxu0 %v2219_v52 }
 0x23d   :  { %v1517_v33 = vadd.f32 %v2128_v32, %v3150_v7  ;;  %v1511_v34 = vpop.f32.mrb[73].mxu1  ;;  %2221 = vmatprep.subr.bf16.mxu0 %v2300_v19 }
 0x23e   :  { %v1512_v36 = vadd.f32 %v3150_v7, %v1511_v34 }
 0x23f   :  { %v1559_v9 = vmax.f32 %v1517_v33, 0.0 }
 0x240   :  { %v1558_v37 = vmax.f32 %v1512_v36, 0.0 }
 0x242   :  { %v2222_v38 = vpack.c.bf16 %v1559_v9, %v1558_v37 }
 0x244   :  { %v2131_v14 = vpop.f32.mrb[74].mxu1  ;;  %2223 = vmatpush3.bf16.xpose.msra.mxu0 %v2222_v38 }
 0x245   :  { %v1527_v39 = vadd.f32 %v2131_v14, %v3150_v7  ;;  %v1521_v42 = vpop.f32.mrb[75].mxu1  ;;  %2224 = vmatprep.subr.bf16.mxu0 %v2300_v19 }
 0x246   :  { %v1522_v3 = vadd.f32 %v3150_v7, %v1521_v42 }
 0x247   :  { %v1561_v49 = vmax.f32 %v1527_v39, 0.0 }
 0x248   :  { %v1560_v43 = vmax.f32 %v1522_v3, 0.0 }
 0x24a   :  { %v2225_v55 = vpack.c.bf16 %v1561_v49, %v1560_v43 }
 0x24c   :  { %v2134_v44 = vpop.f32.mrb[76].mxu1  ;;  %2226 = vmatpush3.bf16.xpose.msra.mxu0 %v2225_v55 }
 0x24d   :  { %v1537_v45 = vadd.f32 %v2134_v44, %v3150_v7  ;;  %v1531_v47 = vpop.f32.mrb[77].mxu1  ;;  %2227 = vmatprep.subr.bf16.mxu0 %v2300_v19 }
 0x24e   :  { %v1532_v2 = vadd.f32 %v3150_v7, %v1531_v47 }
 0x24f   :  { %v1563_v8 = vmax.f32 %v1537_v45, 0.0 }
 0x250   :  { %v1562_v54 = vmax.f32 %v1532_v2, 0.0 }
 0x252   :  { %v2228_v58 = vpack.c.bf16 %v1563_v8, %v1562_v54 }
 0x254   :  { %v2137_v59 = vpop.f32.mrb[78].mxu1  ;;  %2229 = vmatpush3.bf16.xpose.msra.mxu0 %v2228_v58 }
 0x255   :  { %v1547_v61 = vadd.f32 %v2137_v59, %v3150_v7  ;;  %v1541_v62 = vpop.f32.mrb[79].mxu1  ;;  %2230 = vmatprep.subr.bf16.mxu0 %v2300_v19 }
 0x256   :  { %v1542_v0 = vadd.f32 %v3150_v7, %v1541_v62 }
 0x257   :  { %v1565_v48 = vmax.f32 %v1547_v61, 0.0 }
 0x258   :  { %v1564_v1 = vmax.f32 %v1542_v0, 0.0 }
 0x25a   :  { %v2231_v25 = vpack.c.bf16 %v1565_v48, %v1564_v1 }
 0x25c   :  { %2232 = vmatpush3.bf16.xpose.msra.mxu0 %v2231_v25 }
 0x263   :  { %2171 = vmatmul.mubr.f32.vlgmr.msra.gmra.mrb[80].mxu0 %v1566_v4 }
 0x336   :  { %v1633_v13 = vpop.f32.mrb[80].mxu0 }
 0x337   :  { %v1639_v57 = vadd.f32 %v1638_v5, %v1633_v13  ;;  %v2172_v6 = vpop.f32.mrb[81].mxu0 }
 0x339   :  { %1640 = vst [vmem:[%s3193_s9] sm:$0x1] %v1639_v57 }

</bundles_post_ra>
